<compile_context>
chip_gen: v7x
topology: tpu7x:2x2x1
jax: 0.10.0
libtpu: 0.0.40
codegen_flags: <defaults>
</compile_context>

<pallas_src>
import jax
import jax.numpy as jnp
from jax.experimental import pallas as pl
from jax.experimental.pallas import tpu as pltpu


BN_EPS = 1e-5
# Deliberately small so the demo shapes below still exercise multi-tile grids
# and cross-tile BN-stat combination; for production shapes size this against
# the scoped-VMEM budget (16/32/32 MiB default on v5e/v6e/v7x).
ROW_TILE_TARGET = 128
VMEM_LIMIT = 32 * 1024 * 1024


# ----------------------------------------------------------------------------
# Tile-size helpers (all static Python ints)
# ----------------------------------------------------------------------------
def _pick_row_tile(n_rows, target=ROW_TILE_TARGET, unit=1):
    """Largest tile that divides n_rows, is a multiple of `unit` and of 8
    (sublane alignment) and <= target.  Falls back to the full extent, which
    is always a legal block."""
    best = None
    m = 1
    while unit * m <= min(n_rows, max(target, unit)):
        t = unit * m
        if n_rows % t == 0 and t % 8 == 0:
            best = t
        m += 1
    return best if best is not None else n_rows


def _head_batch_tile(n, s2, target_rows=ROW_TILE_TARGET):
    """Batch tile for the head kernel: whole samples per tile, 8-aligned rows,
    8-aligned (or full) output rows."""
    best = None
    for tn in range(1, n + 1):
        if n % tn:
            continue
        tr = tn * s2
        if tn % 8 == 0 and tr % 8 == 0 and tr <= max(target_rows, 8):
            best = tn
    return best if best is not None else n


# ----------------------------------------------------------------------------
# Pallas kernels
# ----------------------------------------------------------------------------
def _gemm_stats_kernel(p_ref, w_ref, y_ref, st_ref):
    # p_ref: (TR, K) patch tile; w_ref: (K, C) conv weight (resident).
    y = jnp.dot(p_ref[...], w_ref[...], preferred_element_type=jnp.float32)
    y_ref[...] = y
    s = jnp.sum(y, axis=0, keepdims=True)
    ss = jnp.sum(y * y, axis=0, keepdims=True)
    st_ref[0] = jnp.concatenate([s, ss], axis=0)          # per-tile partials


def _affine_relu_gemm_stats_kernel(p_ref, sc_ref, sh_ref, w_ref, y_ref, st_ref):
    # Previous stage's BN-apply + ReLU fused onto the raw patch tile (per
    # patch-column scale/shift), then this stage's conv GEMM + BN partials.
    pn = jnp.maximum(p_ref[...] * sc_ref[...] + sh_ref[...], 0.0)
    y = jnp.dot(pn, w_ref[...], preferred_element_type=jnp.float32)
    y_ref[...] = y
    s = jnp.sum(y, axis=0, keepdims=True)
    ss = jnp.sum(y * y, axis=0, keepdims=True)
    st_ref[0] = jnp.concatenate([s, ss], axis=0)


def _bn_relu_head_kernel(y_ref, sc_ref, sh_ref, wt_ref, grp_ref, bh_ref, o_ref):
    # BN2-apply + ReLU + collapsed fc2(fc1(.)) mat-vec + sigmoid per sample.
    yhat = jnp.maximum(y_ref[...] * sc_ref[...] + sh_ref[...], 0.0)   # (TR, C)
    a = yhat * wt_ref[...]                                            # (TR, C)
    z = jnp.dot(grp_ref[...], a, preferred_element_type=jnp.float32)  # (TN, C)
    logits = jnp.sum(z, axis=1, keepdims=True) + bh_ref[...]          # (TN, 1)
    o_ref[...] = jax.nn.sigmoid(logits)


# ----------------------------------------------------------------------------
# pallas_call wrappers
# ----------------------------------------------------------------------------
def _conv_gemm_stats(patches, wmat, *, in_scale=None, in_shift=None):
    r, k = patches.shape
    c = wmat.shape[1]
    tr = _pick_row_tile(r)
    n_tiles = r // tr

    row_spec = pl.BlockSpec((tr, k), lambda i: (i, 0))
    full2 = lambda a: pl.BlockSpec(a.shape, lambda i: (0, 0))

    out_shape = (jax.ShapeDtypeStruct((r, c), jnp.float32),
                 jax.ShapeDtypeStruct((n_tiles, 2, c), jnp.float32))
    out_specs = (pl.BlockSpec((tr, c), lambda i: (i, 0)),
                 pl.BlockSpec((1, 2, c), lambda i: (i, 0, 0)))

    if in_scale is None:
        kernel = _gemm_stats_kernel
        args = (patches, wmat)
        in_specs = [row_spec, full2(wmat)]
    else:
        kernel = _affine_relu_gemm_stats_kernel
        args = (patches, in_scale, in_shift, wmat)
        in_specs = [row_spec, full2(in_scale), full2(in_shift), full2(wmat)]

    y, stats = pl.pallas_call(
        kernel,
        grid=(n_tiles,),
        in_specs=in_specs,
        out_specs=out_specs,
        out_shape=out_shape,
        compiler_params=pltpu.CompilerParams(
            dimension_semantics=("parallel",),
            vmem_limit_bytes=VMEM_LIMIT),
    )(*args)
    return y, stats


def _bn_scale_shift(stats, n_rows, gamma, beta):
    # Combine per-tile partials -> PyTorch training-mode BN (biased variance).
    s = jnp.sum(stats[:, 0, :], axis=0)
    ss = jnp.sum(stats[:, 1, :], axis=0)
    mean = s / n_rows
    var = ss / n_rows - mean * mean
    scale = gamma * jax.lax.rsqrt(var + BN_EPS)
    shift = beta - mean * scale
    return scale, shift


def _bn_relu_head(y2, scale2, shift2, w_head_rows, b_head, n, s2):
    r2, c2 = y2.shape                         # r2 = n * s2
    tn = _head_batch_tile(n, s2)
    tr = tn * s2
    n_tiles = n // tn

    wt = jnp.tile(w_head_rows, (tn, 1))                                   # (tr, c2)
    grp = (jnp.arange(tr) // s2 == jnp.arange(tn)[:, None]).astype(jnp.float32)

    return pl.pallas_call(
        _bn_relu_head_kernel,
        grid=(n_tiles,),
        in_specs=[pl.BlockSpec((tr, c2), lambda i: (i, 0)),
                  pl.BlockSpec((1, c2), lambda i: (0, 0)),
                  pl.BlockSpec((1, c2), lambda i: (0, 0)),
                  pl.BlockSpec((tr, c2), lambda i: (0, 0)),
                  pl.BlockSpec((tn, tr), lambda i: (0, 0)),
                  pl.BlockSpec((1, 1), lambda i: (0, 0))],
        out_specs=pl.BlockSpec((tn, 1), lambda i: (i, 0)),
        out_shape=jax.ShapeDtypeStruct((n, 1), jnp.float32),
        compiler_params=pltpu.CompilerParams(
            dimension_semantics=("parallel",),
            vmem_limit_bytes=VMEM_LIMIT),
    )(y2, scale2[None, :], shift2[None, :], wt, grp, b_head)


# ----------------------------------------------------------------------------
# Glue (layout permutations, im2col, head folding)
# ----------------------------------------------------------------------------
def conv2d_size_out(size, kernel_size=5, stride=2):
    return (size - (kernel_size - 1) - 1) // stride + 1


def im2col(x_nhwc, k, stride):
    n, h, w, c = x_nhwc.shape
    oh = (h - k) // stride + 1
    ow = (w - k) // stride + 1
    cols = []
    for kh in range(k):
        for kw in range(k):
            cols.append(x_nhwc[:, kh:kh + stride * oh:stride,
                               kw:kw + stride * ow:stride, :])
    p = jnp.stack(cols, axis=3)               # (N, OH, OW, k*k, C): (kh, kw, c)
    return p.reshape(n * oh * ow, k * k * c), oh, ow


def pg_forward(x_nchw, p):
    x = jnp.transpose(x_nchw, (0, 2, 3, 1)).astype(jnp.float32)  # -> NHWC
    n = x.shape[0]

    # --- stage 1: conv1 GEMM + BN1 partial stats (conv bias dropped: it only
    # shifts the channel mean, which training-mode BN removes exactly) ---
    p1, oh1, ow1 = im2col(x, 5, 2)
    w1 = jnp.transpose(p["conv1_w"], (2, 3, 1, 0)).reshape(5 * 5 * 3, 16)
    y1, st1 = _conv_gemm_stats(p1, w1)
    scale1, shift1 = _bn_scale_shift(st1, p1.shape[0], p["bn1_g"], p["bn1_b"])

    # --- stage 2: BN1-apply + ReLU fused into conv2 GEMM + BN2 partial stats ---
    p2, oh2, ow2 = im2col(y1.reshape(n, oh1, ow1, 16), 5, 2)
    w2 = jnp.transpose(p["conv2_w"], (2, 3, 1, 0)).reshape(5 * 5 * 16, 32)
    sc1_cols = jnp.tile(scale1, 25)[None, :]      # per patch-column (kh, kw, cin)
    sh1_cols = jnp.tile(shift1, 25)[None, :]
    y2, st2 = _conv_gemm_stats(p2, w2, in_scale=sc1_cols, in_shift=sh1_cols)
    scale2, shift2 = _bn_scale_shift(st2, p2.shape[0], p["bn2_g"], p["bn2_b"])

    # --- stage 3: BN2-apply + ReLU + collapsed fc2(fc1(.)) head + sigmoid ---
    s2 = oh2 * ow2
    L = s2 * 32
    # fc1 weights are stored in PyTorch NCHW-flatten order; permute to the
    # NHWC (oh, ow, c) row order the kernel produces, then fold fc1/fc2 into a
    # single (L, 1) mat-vec (exact: there is no nonlinearity between them).
    w_head = (p["fc1_w"].reshape(10, 32, oh2, ow2).transpose(0, 2, 3, 1)
              .reshape(10, L).T @ p["fc2_w"].T)                      # (L, 1)
    b_head = (p["fc1_b"] @ p["fc2_w"].T + p["fc2_b"]).reshape(1, 1)
    w_head_rows = w_head.reshape(s2, 32)                             # per (oh, ow)
    return _bn_relu_head(y2, scale2, shift2, w_head_rows, b_head, n, s2)


# ----------------------------------------------------------------------------
# Pure-JAX reference (exact PyTorch semantics) for correctness checking
# ----------------------------------------------------------------------------
def reference_forward(x_nchw, p):
    def conv(x, w, b, stride):
        y = jax.lax.conv_general_dilated(
            x, w, (stride, stride), "VALID",
            dimension_numbers=("NCHW", "OIHW", "NCHW"))
        return y + b[None, :, None, None]

    def bn(x, g, bt):
        mean = jnp.mean(x, axis=(0, 2, 3), keepdims=True)
        var = jnp.mean((x - mean) ** 2, axis=(0, 2, 3), keepdims=True)
        return ((x - mean) * jax.lax.rsqrt(var + BN_EPS)
                * g[None, :, None, None] + bt[None, :, None, None])

    y = jax.nn.relu(bn(conv(x_nchw, p["conv1_w"], p["conv1_b"], 2),
                       p["bn1_g"], p["bn1_b"]))
    y = jax.nn.relu(bn(conv(y, p["conv2_w"], p["conv2_b"], 2),
                       p["bn2_g"], p["bn2_b"]))
    f = y.reshape(y.shape[0], -1)                 # NCHW flatten (C-major)
    h = f @ p["fc1_w"].T + p["fc1_b"]
    z = h @ p["fc2_w"].T + p["fc2_b"]
    return jax.nn.sigmoid(z)


# ----------------------------------------------------------------------------
# Deterministic parameter init (shapes from PG.__init__)
# ----------------------------------------------------------------------------
def init_params(key, h, w):
    convw = conv2d_size_out(conv2d_size_out(w))
    convh = conv2d_size_out(conv2d_size_out(h))
    L = convw * convh * 32
    ks = jax.random.split(key, 8)
    f32 = jnp.float32
    return {
        "conv1_w": 0.1 * jax.random.normal(ks[0], (16, 3, 5, 5), f32),
        "conv1_b": 0.1 * jax.random.normal(ks[1], (16,), f32),
        "bn1_g": jnp.ones((16,), f32),
        "bn1_b": jnp.zeros((16,), f32),
        "conv2_w": 0.1 * jax.random.normal(ks[2], (32, 16, 5, 5), f32),
        "conv2_b": 0.1 * jax.random.normal(ks[3], (32,), f32),
        "bn2_g": jnp.ones((32,), f32),
        "bn2_b": jnp.zeros((32,), f32),
        "fc1_w": 0.1 * jax.random.normal(ks[4], (10, L), f32),
        "fc1_b": 0.1 * jax.random.normal(ks[5], (10,), f32),
        "fc2_w": 0.1 * jax.random.normal(ks[6], (1, 10), f32),
        "fc2_b": 0.1 * jax.random.normal(ks[7], (1,), f32),
    }


if __name__ == "__main__":
    key = jax.random.PRNGKey(0)
    kx, kp = jax.random.split(key)

    # Small but non-trivial: 26x26 input -> 11x11 -> 4x4, so all three stages
    # run multi-tile grids (22 / 2 / 2 steps) and exercise the cross-tile
    # BN-stat combination path.
    N, H, W = 16, 26, 26
    x = jax.random.normal(kx, (N, 3, H, W), jnp.float32)
    params = init_params(kp, H, W)

    out = jax.block_until_ready(jax.jit(pg_forward)(x, params))
    assert out.shape == (N, 1), out.shape

    ref = jax.block_until_ready(reference_forward(x, params))
    assert jnp.allclose(out, ref, rtol=1e-3, atol=1e-3), (out, ref)

    print("KERNEL_OK")
</pallas_src>

<mosaic_0001>
module attributes {stable_mosaic.version = 11 : i64} {
  func.func @_gemm_stats_kernel(%arg0: i32, %arg1: memref<88x75xf32, #tpu.memory_space<vmem>>, %arg2: memref<75x16xf32, #tpu.memory_space<vmem>>, %arg3: memref<88x16xf32, #tpu.memory_space<vmem>>, %arg4: memref<1x2x16xf32, #tpu.memory_space<vmem>>) attributes {dimension_semantics = [#tpu.dimension_semantics<parallel>], iteration_bounds = array<i64: 22>, scalar_prefetch = 0 : i64, scratch_operands = 0 : i64, tpu.core_type = #tpu.core_type<tc>, window_params = [{transform_indices = @transform_0, window_bounds = array<i64: 88, 75>}, {pipeline_mode = #tpu.pipeline_mode<synchronous>, transform_indices = @transform_1, window_bounds = array<i64: 75, 16>}, {transform_indices = @transform_2, window_bounds = array<i64: 88, 16>}, {transform_indices = @transform_3, window_bounds = array<i64: 1, 2, 16>}]} {
    %c0 = arith.constant 0 : index
    %c0_0 = arith.constant 0 : index
    %0 = vector.load %arg1[%c0, %c0_0] : memref<88x75xf32, #tpu.memory_space<vmem>>, vector<88x75xf32>
    %c0_1 = arith.constant 0 : index
    %c0_2 = arith.constant 0 : index
    %1 = vector.load %arg2[%c0_1, %c0_2] : memref<75x16xf32, #tpu.memory_space<vmem>>, vector<75x16xf32>
    %cst = arith.constant dense<0.000000e+00> : vector<88x16xf32>
    %2 = tpu.matmul %0, %1, %cst {dimension_numbers = #tpu.dot_dimension_numbers<[1], [0], [0], [1], [0, 0, 1, 1], [], []>} : vector<88x75xf32>, vector<75x16xf32>, vector<88x16xf32> -> vector<88x16xf32>
    %c0_3 = arith.constant 0 : index
    %c0_4 = arith.constant 0 : index
    %3 = vector.load %arg3[%c0_3, %c0_4] : memref<88x16xf32, #tpu.memory_space<vmem>>, vector<88x16xf32>
    tpu.vector_store %arg3[%c0_3, %c0_4], %2 {strides = array<i32>} : memref<88x16xf32, #tpu.memory_space<vmem>>, vector<88x16xf32>,
    %cst_5 = arith.constant dense<0.000000e+00> : vector<16xf32>
    %4 = vector.multi_reduction <add>, %2, %cst_5 [0] : vector<88x16xf32> to vector<16xf32>
    %5 = vector.shape_cast %4 : vector<16xf32> to vector<1x16xf32>
    %6 = arith.mulf %2, %2 : vector<88x16xf32>
    %cst_6 = arith.constant dense<0.000000e+00> : vector<16xf32>
    %7 = vector.multi_reduction <add>, %6, %cst_6 [0] : vector<88x16xf32> to vector<16xf32>
    %8 = vector.shape_cast %7 : vector<16xf32> to vector<1x16xf32>
    %9 = tpu.concatenate %5, %8 in 0 : vector<1x16xf32>, vector<1x16xf32> -> vector<2x16xf32>
    %c0_7 = arith.constant 0 : index
    %c0_8 = arith.constant 0 : index
    %c0_9 = arith.constant 0 : index
    %10 = vector.load %arg4[%c0_7, %c0_8, %c0_9] : memref<1x2x16xf32, #tpu.memory_space<vmem>>, vector<1x2x16xf32>
    %11 = vector.shape_cast %10 : vector<1x2x16xf32> to vector<2x16xf32>
    %12 = vector.shape_cast %9 : vector<2x16xf32> to vector<1x2x16xf32>
    tpu.vector_store %arg4[%c0_7, %c0_8, %c0_9], %12 {strides = array<i32>} : memref<1x2x16xf32, #tpu.memory_space<vmem>>, vector<1x2x16xf32>,
    return
  }
  func.func @transform_0(%arg0: i32) -> (i32, i32) {
    %c0_i32 = arith.constant 0 : i32
    %c0_i32_0 = arith.constant 0 : i32
    return %arg0, %c0_i32 : i32, i32
  }
  func.func @transform_1(%arg0: i32) -> (i32, i32) {
    %c0_i32 = arith.constant 0 : i32
    %c0_i32_0 = arith.constant 0 : i32
    %c0_i32_1 = arith.constant 0 : i32
    return %c0_i32, %c0_i32_0 : i32, i32
  }
  func.func @transform_2(%arg0: i32) -> (i32, i32) {
    %c0_i32 = arith.constant 0 : i32
    %c0_i32_0 = arith.constant 0 : i32
    return %arg0, %c0_i32 : i32, i32
  }
  func.func @transform_3(%arg0: i32) -> (i32, i32, i32) {
    %c0_i32 = arith.constant 0 : i32
    %c0_i32_0 = arith.constant 0 : i32
    %c0_i32_1 = arith.constant 0 : i32
    return %arg0, %c0_i32, %c0_i32_0 : i32, i32, i32
  }
}

module attributes {stable_mosaic.version = 11 : i64} {
  func.func @_affine_relu_gemm_stats_kernel(%arg0: i32, %arg1: memref<128x400xf32, #tpu.memory_space<vmem>>, %arg2: memref<1x400xf32, #tpu.memory_space<vmem>>, %arg3: memref<1x400xf32, #tpu.memory_space<vmem>>, %arg4: memref<400x32xf32, #tpu.memory_space<vmem>>, %arg5: memref<128x32xf32, #tpu.memory_space<vmem>>, %arg6: memref<1x2x32xf32, #tpu.memory_space<vmem>>) attributes {dimension_semantics = [#tpu.dimension_semantics<parallel>], iteration_bounds = array<i64: 2>, scalar_prefetch = 0 : i64, scratch_operands = 0 : i64, tpu.core_type = #tpu.core_type<tc>, window_params = [{transform_indices = @transform_0, window_bounds = array<i64: 128, 400>}, {pipeline_mode = #tpu.pipeline_mode<synchronous>, transform_indices = @transform_1, window_bounds = array<i64: 1, 400>}, {pipeline_mode = #tpu.pipeline_mode<synchronous>, transform_indices = @transform_2, window_bounds = array<i64: 1, 400>}, {pipeline_mode = #tpu.pipeline_mode<synchronous>, transform_indices = @transform_3, window_bounds = array<i64: 400, 32>}, {transform_indices = @transform_4, window_bounds = array<i64: 128, 32>}, {transform_indices = @transform_5, window_bounds = array<i64: 1, 2, 32>}]} {
    %c0 = arith.constant 0 : index
    %c0_0 = arith.constant 0 : index
    %0 = vector.load %arg1[%c0, %c0_0] : memref<128x400xf32, #tpu.memory_space<vmem>>, vector<128x400xf32>
    %c0_1 = arith.constant 0 : index
    %c0_2 = arith.constant 0 : index
    %1 = vector.load %arg2[%c0_1, %c0_2] : memref<1x400xf32, #tpu.memory_space<vmem>>, vector<1x400xf32>
    %2 = vector.broadcast %1 : vector<1x400xf32> to vector<128x400xf32>
    %3 = arith.mulf %0, %2 : vector<128x400xf32>
    %c0_3 = arith.constant 0 : index
    %c0_4 = arith.constant 0 : index
    %4 = vector.load %arg3[%c0_3, %c0_4] : memref<1x400xf32, #tpu.memory_space<vmem>>, vector<1x400xf32>
    %5 = vector.broadcast %4 : vector<1x400xf32> to vector<128x400xf32>
    %6 = arith.addf %3, %5 : vector<128x400xf32>
    %cst = arith.constant 0.000000e+00 : f32
    %7 = vector.broadcast %cst : f32 to vector<128x400xf32>
    %8 = arith.maximumf %6, %7 : vector<128x400xf32>
    %c0_5 = arith.constant 0 : index
    %c0_6 = arith.constant 0 : index
    %9 = vector.load %arg4[%c0_5, %c0_6] : memref<400x32xf32, #tpu.memory_space<vmem>>, vector<400x32xf32>
    %cst_7 = arith.constant dense<0.000000e+00> : vector<128x32xf32>
    %10 = tpu.matmul %8, %9, %cst_7 {dimension_numbers = #tpu.dot_dimension_numbers<[1], [0], [0], [1], [0, 0, 1, 1], [], []>} : vector<128x400xf32>, vector<400x32xf32>, vector<128x32xf32> -> vector<128x32xf32>
    %c0_8 = arith.constant 0 : index
    %c0_9 = arith.constant 0 : index
    %11 = vector.load %arg5[%c0_8, %c0_9] : memref<128x32xf32, #tpu.memory_space<vmem>>, vector<128x32xf32>
    tpu.vector_store %arg5[%c0_8, %c0_9], %10 {strides = array<i32>} : memref<128x32xf32, #tpu.memory_space<vmem>>, vector<128x32xf32>,
    %cst_10 = arith.constant dense<0.000000e+00> : vector<32xf32>
    %12 = vector.multi_reduction <add>, %10, %cst_10 [0] : vector<128x32xf32> to vector<32xf32>
    %13 = vector.shape_cast %12 : vector<32xf32> to vector<1x32xf32>
    %14 = arith.mulf %10, %10 : vector<128x32xf32>
    %cst_11 = arith.constant dense<0.000000e+00> : vector<32xf32>
    %15 = vector.multi_reduction <add>, %14, %cst_11 [0] : vector<128x32xf32> to vector<32xf32>
    %16 = vector.shape_cast %15 : vector<32xf32> to vector<1x32xf32>
    %17 = tpu.concatenate %13, %16 in 0 : vector<1x32xf32>, vector<1x32xf32> -> vector<2x32xf32>
    %c0_12 = arith.constant 0 : index
    %c0_13 = arith.constant 0 : index
    %c0_14 = arith.constant 0 : index
    %18 = vector.load %arg6[%c0_12, %c0_13, %c0_14] : memref<1x2x32xf32, #tpu.memory_space<vmem>>, vector<1x2x32xf32>
    %19 = vector.shape_cast %18 : vector<1x2x32xf32> to vector<2x32xf32>
    %20 = vector.shape_cast %17 : vector<2x32xf32> to vector<1x2x32xf32>
    tpu.vector_store %arg6[%c0_12, %c0_13, %c0_14], %20 {strides = array<i32>} : memref<1x2x32xf32, #tpu.memory_space<vmem>>, vector<1x2x32xf32>,
    return
  }
  func.func @transform_0(%arg0: i32) -> (i32, i32) {
    %c0_i32 = arith.constant 0 : i32
    %c0_i32_0 = arith.constant 0 : i32
    return %arg0, %c0_i32 : i32, i32
  }
  func.func @transform_1(%arg0: i32) -> (i32, i32) {
    %c0_i32 = arith.constant 0 : i32
    %c0_i32_0 = arith.constant 0 : i32
    %c0_i32_1 = arith.constant 0 : i32
    return %c0_i32, %c0_i32_0 : i32, i32
  }
  func.func @transform_2(%arg0: i32) -> (i32, i32) {
    %c0_i32 = arith.constant 0 : i32
    %c0_i32_0 = arith.constant 0 : i32
    %c0_i32_1 = arith.constant 0 : i32
    return %c0_i32, %c0_i32_0 : i32, i32
  }
  func.func @transform_3(%arg0: i32) -> (i32, i32) {
    %c0_i32 = arith.constant 0 : i32
    %c0_i32_0 = arith.constant 0 : i32
    %c0_i32_1 = arith.constant 0 : i32
    return %c0_i32, %c0_i32_0 : i32, i32
  }
  func.func @transform_4(%arg0: i32) -> (i32, i32) {
    %c0_i32 = arith.constant 0 : i32
    %c0_i32_0 = arith.constant 0 : i32
    return %arg0, %c0_i32 : i32, i32
  }
  func.func @transform_5(%arg0: i32) -> (i32, i32, i32) {
    %c0_i32 = arith.constant 0 : i32
    %c0_i32_0 = arith.constant 0 : i32
    %c0_i32_1 = arith.constant 0 : i32
    return %arg0, %c0_i32, %c0_i32_0 : i32, i32, i32
  }
}

module attributes {stable_mosaic.version = 11 : i64} {
  func.func @_bn_relu_head_kernel(%arg0: i32, %arg1: memref<128x32xf32, #tpu.memory_space<vmem>>, %arg2: memref<1x32xf32, #tpu.memory_space<vmem>>, %arg3: memref<1x32xf32, #tpu.memory_space<vmem>>, %arg4: memref<128x32xf32, #tpu.memory_space<vmem>>, %arg5: memref<8x128xf32, #tpu.memory_space<vmem>>, %arg6: memref<1x1xf32, #tpu.memory_space<vmem>>, %arg7: memref<8x1xf32, #tpu.memory_space<vmem>>) attributes {dimension_semantics = [#tpu.dimension_semantics<parallel>], iteration_bounds = array<i64: 2>, scalar_prefetch = 0 : i64, scratch_operands = 0 : i64, tpu.core_type = #tpu.core_type<tc>, window_params = [{transform_indices = @transform_0, window_bounds = array<i64: 128, 32>}, {pipeline_mode = #tpu.pipeline_mode<synchronous>, transform_indices = @transform_1, window_bounds = array<i64: 1, 32>}, {pipeline_mode = #tpu.pipeline_mode<synchronous>, transform_indices = @transform_2, window_bounds = array<i64: 1, 32>}, {pipeline_mode = #tpu.pipeline_mode<synchronous>, transform_indices = @transform_3, window_bounds = array<i64: 128, 32>}, {pipeline_mode = #tpu.pipeline_mode<synchronous>, transform_indices = @transform_4, window_bounds = array<i64: 8, 128>}, {pipeline_mode = #tpu.pipeline_mode<synchronous>, transform_indices = @transform_5, window_bounds = array<i64: 1, 1>}, {transform_indices = @transform_6, window_bounds = array<i64: 8, 1>}]} {
    %c0 = arith.constant 0 : index
    %c0_0 = arith.constant 0 : index
    %0 = vector.load %arg1[%c0, %c0_0] : memref<128x32xf32, #tpu.memory_space<vmem>>, vector<128x32xf32>
    %c0_1 = arith.constant 0 : index
    %c0_2 = arith.constant 0 : index
    %1 = vector.load %arg2[%c0_1, %c0_2] : memref<1x32xf32, #tpu.memory_space<vmem>>, vector<1x32xf32>
    %2 = vector.broadcast %1 : vector<1x32xf32> to vector<128x32xf32>
    %3 = arith.mulf %0, %2 : vector<128x32xf32>
    %c0_3 = arith.constant 0 : index
    %c0_4 = arith.constant 0 : index
    %4 = vector.load %arg3[%c0_3, %c0_4] : memref<1x32xf32, #tpu.memory_space<vmem>>, vector<1x32xf32>
    %5 = vector.broadcast %4 : vector<1x32xf32> to vector<128x32xf32>
    %6 = arith.addf %3, %5 : vector<128x32xf32>
    %cst = arith.constant 0.000000e+00 : f32
    %7 = vector.broadcast %cst : f32 to vector<128x32xf32>
    %8 = arith.maximumf %6, %7 : vector<128x32xf32>
    %c0_5 = arith.constant 0 : index
    %c0_6 = arith.constant 0 : index
    %9 = vector.load %arg4[%c0_5, %c0_6] : memref<128x32xf32, #tpu.memory_space<vmem>>, vector<128x32xf32>
    %10 = arith.mulf %8, %9 : vector<128x32xf32>
    %c0_7 = arith.constant 0 : index
    %c0_8 = arith.constant 0 : index
    %11 = vector.load %arg5[%c0_7, %c0_8] : memref<8x128xf32, #tpu.memory_space<vmem>>, vector<8x128xf32>
    %cst_9 = arith.constant dense<0.000000e+00> : vector<8x32xf32>
    %12 = tpu.matmul %11, %10, %cst_9 {dimension_numbers = #tpu.dot_dimension_numbers<[1], [0], [0], [1], [0, 0, 1, 1], [], []>} : vector<8x128xf32>, vector<128x32xf32>, vector<8x32xf32> -> vector<8x32xf32>
    %cst_10 = arith.constant dense<0.000000e+00> : vector<8xf32>
    %13 = vector.multi_reduction <add>, %12, %cst_10 [1] : vector<8x32xf32> to vector<8xf32>
    %14 = vector.shape_cast %13 : vector<8xf32> to vector<8x1xf32>
    %c0_11 = arith.constant 0 : index
    %c0_12 = arith.constant 0 : index
    %15 = vector.load %arg6[%c0_11, %c0_12] : memref<1x1xf32, #tpu.memory_space<vmem>>, vector<1x1xf32>
    %16 = vector.broadcast %15 : vector<1x1xf32> to vector<8x1xf32>
    %17 = arith.addf %14, %16 : vector<8x1xf32>
    %18 = arith.negf %17 : vector<8x1xf32>
    %19 = math.exp %18 : vector<8x1xf32>
    %cst_13 = arith.constant 1.000000e+00 : f32
    %20 = vector.broadcast %cst_13 : f32 to vector<8x1xf32>
    %21 = arith.addf %20, %19 : vector<8x1xf32>
    %22 = arith.divf %20, %21 : vector<8x1xf32>
    %c0_14 = arith.constant 0 : index
    %c0_15 = arith.constant 0 : index
    %23 = vector.load %arg7[%c0_14, %c0_15] : memref<8x1xf32, #tpu.memory_space<vmem>>, vector<8x1xf32>
    tpu.vector_store %arg7[%c0_14, %c0_15], %22 {strides = array<i32>} : memref<8x1xf32, #tpu.memory_space<vmem>>, vector<8x1xf32>,
    return
  }
  func.func @transform_0(%arg0: i32) -> (i32, i32) {
    %c0_i32 = arith.constant 0 : i32
    %c0_i32_0 = arith.constant 0 : i32
    return %arg0, %c0_i32 : i32, i32
  }
  func.func @transform_1(%arg0: i32) -> (i32, i32) {
    %c0_i32 = arith.constant 0 : i32
    %c0_i32_0 = arith.constant 0 : i32
    %c0_i32_1 = arith.constant 0 : i32
    return %c0_i32, %c0_i32_0 : i32, i32
  }
  func.func @transform_2(%arg0: i32) -> (i32, i32) {
    %c0_i32 = arith.constant 0 : i32
    %c0_i32_0 = arith.constant 0 : i32
    %c0_i32_1 = arith.constant 0 : i32
    return %c0_i32, %c0_i32_0 : i32, i32
  }
  func.func @transform_3(%arg0: i32) -> (i32, i32) {
    %c0_i32 = arith.constant 0 : i32
    %c0_i32_0 = arith.constant 0 : i32
    %c0_i32_1 = arith.constant 0 : i32
    return %c0_i32, %c0_i32_0 : i32, i32
  }
  func.func @transform_4(%arg0: i32) -> (i32, i32) {
    %c0_i32 = arith.constant 0 : i32
    %c0_i32_0 = arith.constant 0 : i32
    %c0_i32_1 = arith.constant 0 : i32
    return %c0_i32, %c0_i32_0 : i32, i32
  }
  func.func @transform_5(%arg0: i32) -> (i32, i32) {
    %c0_i32 = arith.constant 0 : i32
    %c0_i32_0 = arith.constant 0 : i32
    %c0_i32_1 = arith.constant 0 : i32
    return %c0_i32, %c0_i32_0 : i32, i32
  }
  func.func @transform_6(%arg0: i32) -> (i32, i32) {
    %c0_i32 = arith.constant 0 : i32
    %c0_i32_0 = arith.constant 0 : i32
    return %arg0, %c0_i32 : i32, i32
  }
}

</mosaic_0001>

<bundles_post_ra>
// kernel: pg_forward.3
= control target key start
LH: loop header
LB: loop body
LE: loop exit
PB: predicated region body
PF: predicated region fallthrough
CT: control target
= control target key end

     0   :  { %s698_s12 = smov 0   ;;  %s852_s0 = inlined_call_operand.vmem [shape: f32[1936,75], index: 0, kind: input, shape index: {}]   ;;  %s853_s1 = inlined_call_operand.vmem [shape: f32[75,16], index: 1, kind: input, shape index: {}]   ;;  %s854_s2 = inlined_call_operand.vmem [shape: f32[1936,16], index: 2, kind: output, shape index: {0}]   ;;  %s855_s3 = inlined_call_operand.vmem [shape: f32[22,2,16], index: 3, kind: output, shape index: {1}]  }
   0x1 LB: > { %s704_s13 = sadd.s32 4294967295, %s672_s12   ;;  %p536_p0 = scmp.ge.s32.totalorder %s672_s12, 1  ;;  %s672_s12 = sphi %s698_s12, %s14_s12  }
   0x2   : > { %p141_p1 = scmp.lt.s32.totalorder %s672_s12, 23 }
   0x4   : > { %p142_p2 = pnand %p536_p0, %p141_p1 }
   0x5   : > { %v196_v0 = vld [vmem:[%s853_s1] sm:$0xff] (!%p142_p2)  ;;  %v197_v1 = vld [vmem:[%s853_s1 + $0x8] sm:$0xff] (!%p142_p2)  ;;  %v198_v2 = vld [vmem:[%s853_s1 + $0x10] sm:$0xff] (!%p142_p2)  ;;  %v674_v3 = vmov (!%p142_p2), 0.0|0.0   ;;  %s169_s22 = smul.u32 (!%p142_p2), 11, %s704_s13  ;;  %vm675_vm0 = vmmov (!%p142_p2), 0  }
   0x6   : > { %145 = sbr.rel (%p142_p2) target bundleno = 288 (0x120), region = 28  ;;  %628 = vmatprep.subr.bf16.mxu0 (!%p142_p2), %v674_v3  ;;  %v629_v4 = vpack.c.bf16 (!%p142_p2), %v197_v1, %v196_v0  ;;  %v199_v5 = vld [vmem:[%s853_s1 + $0x18] sm:$0xff] (!%p142_p2)  ;;  %644 = vmatprep.subr.bf16.mxu1 (!%p142_p2), %v674_v3  ;;  %v676_v6 = vmov (!%p142_p2), 0.0   ;;  %v200_v8 = vld [vmem:[%s853_s1 + $0x20] sm:$0xff] (!%p142_p2)  ;;  %v201_v9 = vld [vmem:[%s853_s1 + $0x28] sm:$0xff] (!%p142_p2)  ;;  %vm240_vm1 = vcmask (!%p142_p2), 1042432  }
   0x7   : > { %595 = vmatprep.mubr.msk.f32.mxu0 (!%p142_p2), %vm675_vm0, %v676_v6  ;;  %613 = vmatprep.mubr.msk.f32.mxu1 (!%p142_p2), %vm675_vm0, %v676_v6  ;;  %v632_v7 = vpack.c.bf16 (!%p142_p2), %v199_v5, %v198_v2  ;;  %p170_p3 = scmp.lt.s32.totalorder (!%p142_p2), %s169_s22, 241  ;;  %v635_v10 = vpack.c.bf16 (!%p142_p2), %v201_v9, %v200_v8  ;;  %v202_v11 = vld [vmem:[%s853_s1 + $0x30] sm:$0xff] (!%p142_p2)  ;;  %v203_v12 = vld [vmem:[%s853_s1 + $0x38] sm:$0xff] (!%p142_p2)  ;;  %v204_v14 = vld [vmem:[%s853_s1 + $0x40] sm:$0xff] (!%p142_p2)  ;;  %vm677_vm2 = vmmov (!%p142_p2), 1   ;;  %vm206_vm4 = vcmask (!%p142_p2), 613376  }
   0x8   : > { %630 = vmatpush3.bf16.msra.mxu0 (!%p142_p2), %v629_v4  ;;  %649 = vmatpush3.bf16.msra.mxu1 (!%p142_p2), %v629_v4  ;;  %v638_v13 = vpack.c.bf16 (!%p142_p2), %v203_v12, %v202_v11  ;;  %v205_v15 = vld [vmem:[%s853_s1 + $0x48] sm:$0x7] (!%p142_p2)  ;;  %vm642_vm3 = vmpackc.low (!%p142_p2), %vm240_vm1, %vm677_vm2  ;;  %vm364_vm5 = vcmask (!%p142_p2), 130048   ;;  %p181_p4 = scmp.lt.s32.totalorder (!%p142_p2), %s704_s13, 21  ;;  %vm441_vm6 = vcmask (!%p142_p2), 1040384   ;;  %vm443_vm7 = vcmask (!%p142_p2), 123904  }
   0x9   : > { %631 = vmatprep.subr.bf16.mxu0 (!%p142_p2), %v674_v3  ;;  %645 = vmatprep.subr.bf16.mxu1 (!%p142_p2), %v674_v3  ;;  %v641_v16 = vpack.c.bf16 (!%p142_p2), %v205_v15, %v204_v14 }
   0xc   : > { %633 = vmatpush3.bf16.msra.mxu0 (!%p142_p2), %v632_v7  ;;  %650 = vmatpush3.bf16.msra.mxu1 (!%p142_p2), %v632_v7 }
   0xd   : > { %634 = vmatprep.subr.bf16.mxu0 %v674_v3  ;;  %646 = vmatprep.subr.bf16.mxu1 %v674_v3  ;;  %s857_s22 = smov (!%p170_p3, %s169_s22), 241  ;;  %s859_s13 = smov (!%p181_p4, %s704_s13), 21 }
   0xe   : > { %s537_s8 = sshll.u32 %s857_s22, 3  ;;  %s539_s17 = sshll.u32 %s859_s13, 1 }
   0xf   : > { %s751_s11 = scalar_lea.vmem %s852_s0, %s537_s8  ;;  %s798_s16 = scalar_lea.vmem %s854_s2, %s537_s8 }
  0x10   : > { %636 = vmatpush3.bf16.msra.mxu0 %v635_v10  ;;  %651 = vmatpush3.bf16.msra.mxu1 %v635_v10  ;;  %v185_v17 = vld [vmem:[%s751_s11] sm:$0xff]  ;;  %v191_v18 = vld [vmem:[%s751_s11 + $0x30] sm:$0xff]  ;;  %v186_v19 = vld [vmem:[%s751_s11 + $0x8] sm:$0xff]  ;;  %s184_s20 = scalar_lea.vmem %s855_s3, %s539_s17 }
  0x11   : > { %637 = vmatprep.subr.bf16.mxu0 %v674_v3  ;;  %647 = vmatprep.subr.bf16.mxu1 %v674_v3  ;;  %v192_v20 = vld [vmem:[%s751_s11 + $0x38] sm:$0xff]  ;;  %v187_v21 = vld [vmem:[%s751_s11 + $0x10] sm:$0xff]  ;;  %v193_v22 = vld [vmem:[%s751_s11 + $0x40] sm:$0xff] }
  0x12   : > { %v188_v23 = vld [vmem:[%s751_s11 + $0x18] sm:$0xff]  ;;  %v194_v24 = vld [vmem:[%s751_s11 + $0x48] sm:$0xff]  ;;  %v189_v25 = vld [vmem:[%s751_s11 + $0x20] sm:$0xff] }
  0x13   : > { %v195_v26 = vld [vmem:[%s751_s11 + $0x50] sm:$0xff]  ;;  %v190_v27 = vld [vmem:[%s751_s11 + $0x28] sm:$0xff] }
  0x14   : > { %639 = vmatpush3.bf16.msra.mxu0 %v638_v13  ;;  %652 = vmatpush3.bf16.msra.mxu1 %v638_v13 }
  0x15   : > { %640 = vmatprep.subr.bf16.mxu0 %v674_v3  ;;  %648 = vmatprep.subr.bf16.mxu1 %v674_v3 }
  0x18   : > { %643 = vmatpush3.bf16.msk.msra.mxu0 %vm642_vm3, %v641_v16  ;;  %653 = vmatpush3.bf16.msk.msra.mxu1 %vm642_vm3, %v641_v16 }
  0x1b   : > { %596 = vmatmul.mubr.msk.f32.vlgmr.msra.gmra.mrb[0].mxu0 %vm206_vm4, %v185_v17  ;;  %614 = vmatmul.mubr.msk.f32.vlgmr.msra.gmra.mrb[0].mxu1 %vm206_vm4, %v191_v18 }
  0x1c   : > { %598 = vmatprep.mubr.msk.f32.mxu0 %vm675_vm0, %v676_v6  ;;  %616 = vmatprep.mubr.msk.f32.mxu1 %vm675_vm0, %v676_v6 }
  0x1f   : > { %599 = vmatmul.mubr.msk.f32.gmra.mrb[2].mxu0 %vm206_vm4, %v186_v19  ;;  %617 = vmatmul.mubr.msk.f32.gmra.mrb[2].mxu1 %vm206_vm4, %v192_v20 }
  0x20   : > { %601 = vmatprep.mubr.msk.f32.mxu0 %vm675_vm0, %v676_v6  ;;  %619 = vmatprep.mubr.msk.f32.mxu1 %vm675_vm0, %v676_v6 }
  0x23   : > { %602 = vmatmul.mubr.msk.f32.gmra.mrb[4].mxu0 %vm206_vm4, %v187_v21  ;;  %620 = vmatmul.mubr.msk.f32.gmra.mrb[4].mxu1 %vm206_vm4, %v193_v22 }
  0x24   : > { %604 = vmatprep.mubr.msk.f32.mxu0 %vm675_vm0, %v676_v6  ;;  %622 = vmatprep.mubr.msk.f32.mxu1 %vm675_vm0, %v676_v6 }
  0x27   : > { %605 = vmatmul.mubr.msk.f32.gmra.mrb[6].mxu0 %vm206_vm4, %v188_v23  ;;  %623 = vmatmul.mubr.msk.f32.gmra.mrb[6].mxu1 %vm206_vm4, %v194_v24 }
  0x28   : > { %607 = vmatprep.mubr.msk.f32.mxu0 %vm675_vm0, %v676_v6  ;;  %625 = vmatprep.mubr.msk.f32.mxu1 %vm675_vm0, %v676_v6 }
  0x2b   : > { %608 = vmatmul.mubr.msk.f32.gmra.mrb[8].mxu0 %vm206_vm4, %v189_v25  ;;  %626 = vmatmul.mubr.msk.f32.gmra.mrb[8].mxu1 %vm206_vm4, %v195_v26 }
  0x2c   : > { %610 = vmatprep.mubr.msk.f32.mxu0 %vm675_vm0, %v676_v6 }
  0x2f   : > { %611 = vmatmul.mubr.msk.f32.gmra.mrb[10].mxu0 %vm206_vm4, %v190_v27 }
  0xee   : > { %v310_v28 = vpop.f32.mrb[0].mxu0  ;;  %v340_v29 = vpop.f32.mrb[0].mxu1 }
  0xef   : > { %365 = vst.msk [vmem:[%s798_s16] sm:$0xff] %vm364_vm5, %v310_v28  ;;  %v597_v30 = vpop.f32.mrb[1].mxu0  ;;  %371 = vst.msk [vmem:[%s798_s16 + $0x30] sm:$0xff] %vm364_vm5, %v340_v29  ;;  %v615_v31 = vpop.f32.mrb[1].mxu1  ;;  %v403_v32 = vmul.f32 %v310_v28, %v310_v28  ;;  %v376_v35 = vsel %vm364_vm5, %v310_v28, 0.0  ;;  %v409_v8 = vmul.f32 %v340_v29, %v340_v29  ;;  %v387_v13 = vsel %vm364_vm5, %v340_v29, 0.0 }
  0xf1   : > { %v414_v41 = vsel %vm364_vm5, %v403_v32, 0.0  ;;  %v425_v18 = vsel %vm364_vm5, %v409_v8, 0.0 }
  0xf2   : > { %v315_v33 = vpop.f32.mrb[2].mxu0  ;;  %v345_v34 = vpop.f32.mrb[2].mxu1 }
  0xf3   : > { %366 = vst.msk [vmem:[%s798_s16 + $0x8] sm:$0xff] %vm364_vm5, %v315_v33  ;;  %v377_v36 = vsel %vm364_vm5, %v315_v33, 0.0  ;;  %v404_v37 = vmul.f32 %v315_v33, %v315_v33  ;;  %v600_v38 = vpop.f32.mrb[3].mxu0  ;;  %372 = vst.msk [vmem:[%s798_s16 + $0x38] sm:$0xff] %vm364_vm5, %v345_v34  ;;  %v618_v39 = vpop.f32.mrb[3].mxu1  ;;  %v410_v14 = vmul.f32 %v345_v34, %v345_v34  ;;  %v389_v19 = vsel %vm364_vm5, %v345_v34, 0.0 }
  0xf4   : > { %v378_v40 = vadd.f32 %v377_v36, %v376_v35 }
  0xf5   : > { %v415_v42 = vsel %vm364_vm5, %v404_v37, 0.0  ;;  %v427_v23 = vsel %vm364_vm5, %v410_v14, 0.0 }
  0xf6   : > { %v416_v43 = vadd.f32 %v415_v42, %v414_v41  ;;  %v320_v44 = vpop.f32.mrb[4].mxu0  ;;  %v350_v45 = vpop.f32.mrb[4].mxu1 }
  0xf7   : > { %367 = vst.msk [vmem:[%s798_s16 + $0x10] sm:$0xff] %vm364_vm5, %v320_v44  ;;  %v379_v46 = vsel %vm364_vm5, %v320_v44, 0.0  ;;  %v405_v47 = vmul.f32 %v320_v44, %v320_v44  ;;  %v603_v48 = vpop.f32.mrb[5].mxu0  ;;  %373 = vst.msk [vmem:[%s798_s16 + $0x40] sm:$0xff] %vm364_vm5, %v350_v45  ;;  %v621_v49 = vpop.f32.mrb[5].mxu1  ;;  %v411_v20 = vmul.f32 %v350_v45, %v350_v45  ;;  %v391_v24 = vsel %vm364_vm5, %v350_v45, 0.0 }
  0xf8   : > { %v380_v50 = vadd.f32 %v379_v46, %v378_v40 }
  0xf9   : > { %v417_v51 = vsel %vm364_vm5, %v405_v47, 0.0  ;;  %v429_v29 = vsel %vm364_vm5, %v411_v20, 0.0 }
  0xfa   : > { %v418_v52 = vadd.f32 %v417_v51, %v416_v43  ;;  %v325_v53 = vpop.f32.mrb[6].mxu0  ;;  %v355_v54 = vpop.f32.mrb[6].mxu1 }
  0xfb   : > { %368 = vst.msk [vmem:[%s798_s16 + $0x18] sm:$0xff] %vm364_vm5, %v325_v53  ;;  %v381_v55 = vsel %vm364_vm5, %v325_v53, 0.0  ;;  %v406_v56 = vmul.f32 %v325_v53, %v325_v53  ;;  %v606_v57 = vpop.f32.mrb[7].mxu0  ;;  %374 = vst.msk [vmem:[%s798_s16 + $0x48] sm:$0xff] %vm364_vm5, %v355_v54  ;;  %v624_v58 = vpop.f32.mrb[7].mxu1  ;;  %v412_v25 = vmul.f32 %v355_v54, %v355_v54  ;;  %v393_v30 = vsel %vm364_vm5, %v355_v54, 0.0 }
  0xfc   : > { %v382_v59 = vadd.f32 %v381_v55, %v380_v50 }
  0xfd   : > { %v419_v60 = vsel %vm364_vm5, %v406_v56, 0.0  ;;  %v431_v34 = vsel %vm364_vm5, %v412_v25, 0.0 }
  0xfe   : > { %v420_v61 = vadd.f32 %v419_v60, %v418_v52  ;;  %v330_v62 = vpop.f32.mrb[8].mxu0  ;;  %v360_v63 = vpop.f32.mrb[8].mxu1 }
  0xff   : > { %369 = vst.msk [vmem:[%s798_s16 + $0x20] sm:$0xff] %vm364_vm5, %v330_v62  ;;  %v383_v0 = vsel %vm364_vm5, %v330_v62, 0.0  ;;  %v407_v1 = vmul.f32 %v330_v62, %v330_v62  ;;  %v609_v2 = vpop.f32.mrb[9].mxu0  ;;  %375 = vst.msk [vmem:[%s798_s16 + $0x50] sm:$0xff] %vm364_vm5, %v360_v63  ;;  %v627_v3 = vpop.f32.mrb[9].mxu1  ;;  %v413_v26 = vmul.f32 %v360_v63, %v360_v63  ;;  %v395_v31 = vsel %vm364_vm5, %v360_v63, 0.0 }
 0x100   : > { %v384_v4 = vadd.f32 %v383_v0, %v382_v59 }
 0x101   : > { %v421_v5 = vsel %vm364_vm5, %v407_v1, 0.0  ;;  %v433_v35 = vsel %vm364_vm5, %v413_v26, 0.0 }
 0x102   : > { %v422_v6 = vadd.f32 %v421_v5, %v420_v61  ;;  %v335_v7 = vpop.f32.mrb[10].mxu0 }
 0x103   : > { %370 = vst.msk [vmem:[%s798_s16 + $0x28] sm:$0xff] %vm364_vm5, %v335_v7  ;;  %v385_v9 = vsel %vm364_vm5, %v335_v7, 0.0  ;;  %v408_v10 = vmul.f32 %v335_v7, %v335_v7  ;;  %v612_v11 = vpop.f32.mrb[11].mxu0 }
 0x104   : > { %v386_v12 = vadd.f32 %v385_v9, %v384_v4 }
 0x105   : > { %v423_v15 = vsel %vm364_vm5, %v408_v10, 0.0 }
 0x106   : > { %v388_v16 = vadd.f32 %v387_v13, %v386_v12  ;;  %v424_v17 = vadd.f32 %v423_v15, %v422_v6 }
 0x108   : > { %v426_v21 = vadd.f32 %v425_v18, %v424_v17  ;;  %v390_v22 = vadd.f32 %v389_v19, %v388_v16 }
 0x10a   : > { %v392_v27 = vadd.f32 %v391_v24, %v390_v22  ;;  %v428_v28 = vadd.f32 %v427_v23, %v426_v21 }
 0x10c   : > { %v430_v32 = vadd.f32 %v429_v29, %v428_v28  ;;  %v394_v33 = vadd.f32 %v393_v30, %v392_v27 }
 0x10e   : > { %v432_v36 = vadd.f32 %v431_v34, %v430_v32  ;;  %v396_v37 = vadd.f32 %v395_v31, %v394_v33 }
 0x110   : > { %v397_v38 = vrot.slane %v396_v37, 4  ;;  %v434_v39 = vadd.f32 %v433_v35, %v432_v36 }
 0x112   : > { %v398_v40 = vadd.f32 %v397_v38, %v396_v37  ;;  %v435_v41 = vrot.slane %v434_v39, 4 }
 0x114   : > { %v399_v42 = vrot.slane %v398_v40, 2  ;;  %v436_v43 = vadd.f32 %v435_v41, %v434_v39 }
 0x116   : > { %v400_v44 = vadd.f32 %v399_v42, %v398_v40  ;;  %v437_v45 = vrot.slane %v436_v43, 2 }
 0x118   : > { %v401_v46 = vrot.slane %v400_v44, 1  ;;  %v438_v47 = vadd.f32 %v437_v45, %v436_v43 }
 0x11a   : > { %v439_v48 = vrot.slane %v438_v47, 1  ;;  %v402_v49 = vadd.f32 %v401_v46, %v400_v44 }
 0x11c   : > { %v440_v50 = vadd.f32 %v439_v48, %v438_v47 }
 0x11e   : > { %v442_v51 = vsel %vm441_vm6, %v402_v49, %v440_v50 }
 0x11f   : > { %444 = vst.msk [vmem:[%s184_s20] sm:$0x3] %vm443_vm7, %v442_v51 }
 0x120 PF: > { %s14_s12 = sadd.s32 1, %s672_s12  }
 0x121   : > { %p11_p5 = scmp.ge.s32.totalorder %s14_s12, 24  }
 0x123   :  { %13 = sbr.rel (!%p11_p5) target bundleno = 1 (0x1), region = 70 }

// kernel: tile.17
= control target key start
LH: loop header
LB: loop body
LE: loop exit
PB: predicated region body
PF: predicated region fallthrough
CT: control target
= control target key end

     0   :  { %s40_s0 = inlined_call_operand.vmem [shape: f32[16], index: 0, kind: input, shape index: {}]   ;;  %s41_s1 = inlined_call_operand.vmem [shape: f32[25,16], index: 1, kind: output, shape index: {}]  }
   0x1   :  { %v4_v0 = vld [vmem:[%s40_s0] ss:$0 sm:$0xff] }
   0x2   :  { %5 = vst [vmem:[%s41_s1] sm:$0xff] %v4_v0  ;;  %12 = vst [vmem:[%s41_s1 + $0x8] sm:$0xff] %v4_v0 }
   0x3   :  { %13 = vst [vmem:[%s41_s1 + $0x10] sm:$0xff] %v4_v0  ;;  %14 = vst [vmem:[%s41_s1 + $0x18] sm:$0xff] %v4_v0 }

// kernel: tile.18
= control target key start
LH: loop header
LB: loop body
LE: loop exit
PB: predicated region body
PF: predicated region fallthrough
CT: control target
= control target key end

     0   :  { %s89_s8 = smov 112   ;;  %s90_s11 = smov 80   ;;  %vm3_vm0 = vcmask 130048   ;;  %vm9_vm1 = vcmask 1048448   ;;  %vm15_vm2 = vcmask 917248   ;;  %vm21_vm3 = vcmask 786048   ;;  %s142_s0 = inlined_call_operand.vmem [shape: f32[25,16], index: 0, kind: input, shape index: {}]   ;;  %s143_s1 = inlined_call_operand.vmem [shape: f32[1,400], index: 1, kind: output, shape index: {}]  }
   0x1   :  { %v72_v0 = vld [vmem:[%s142_s0 + $0x7] ss:$8 sm:$0x7]   ;;  %v74_v1 = vld [vmem:[%s142_s0 + $0x5] ss:$8 sm:$0x7]  }
   0x2   :  { %7 = vrot.lane.b32.xlu0 %v72_v0, %s89_s8  ;;  %19 = vrot.lane.b32.xlu1 %v74_v1, %s90_s11  ;;  %v73_v2 = vld [vmem:[%s142_s0 + $0x6] ss:$8 sm:$0x7]   ;;  %v75_v3 = vld [vmem:[%s142_s0 + $0x4] ss:$8 sm:$0x7]  }
   0x3   :  { %s91_s16 = smov 96   ;;  %v2_v4 = vld [vmem:[%s142_s0] ss:$8 sm:$0xf]   ;;  %s92_s19 = smov 64   ;;  %vm27_vm4 = vcmask 654848  }
   0x4   :  { %v76_v5 = vld [vmem:[%s142_s0 + $0x3] ss:$8 sm:$0x7]   ;;  %4 = vst.msk [vmem:[#allocation0] ss:$8 sm:$0xf] %vm3_vm0, %v2_v4  }
   0x5   :  { %v77_v6 = vld [vmem:[%s142_s0 + $0x2] ss:$8 sm:$0x7]   ;;  %s93_s24 = smov 48   ;;  %s94_s25 = smov 32   ;;  %vm33_vm5 = vcmask 523648  }
   0x6   :  { %13 = vrot.lane.b32.xlu0 %v73_v2, %s91_s16  ;;  %25 = vrot.lane.b32.xlu1 %v75_v3, %s92_s19  ;;  %v78_v7 = vld [vmem:[%s142_s0 + $0x1] ss:$8 sm:$0x7]   ;;  %s95_s0 = smov 16   ;;  %vm39_vm6 = vcmask 392448   ;;  %vm45_vm7 = vcmask 261248  }
   0xa   :  { %31 = vrot.lane.b32.xlu0 %v76_v5, %s93_s24  ;;  %37 = vrot.lane.b32.xlu1 %v77_v6, %s94_s25 }
   0xb   :  { %v65_v8 = vld [vmem:[#allocation0 + $0x18] sm:$0x1] }
   0xc   :  { %81 = vst [vmem:[%s143_s1 + $0x3] sm:$0x1] %v65_v8 }
   0xe   :  { %43 = vrot.lane.b32.xlu0 %v78_v7, %s95_s0 }
  0x74   :  { %v8_v9 = vpop.permute.xlu0 %7   ;;  %v20_v10 = vpop.permute.xlu1 %19  }
  0x75   :  { %10 = vst.msk [vmem:[#allocation0] ss:$8 sm:$0x7] %vm9_vm1, %v8_v9  }
  0x78   :  { %v14_v11 = vpop.permute.xlu0 %13   ;;  %v26_v12 = vpop.permute.xlu1 %25  }
  0x79   :  { %16 = vst.msk [vmem:[#allocation0] ss:$8 sm:$0x7] %vm15_vm2, %v14_v11  }
  0x7a   :  { %22 = vst.msk [vmem:[#allocation0] ss:$8 sm:$0x7] %vm21_vm3, %v20_v10  }
  0x7b   :  { %28 = vst.msk [vmem:[#allocation0] ss:$8 sm:$0x7] %vm27_vm4, %v26_v12  }
  0x7c   :  { %v32_v13 = vpop.permute.xlu0 %31   ;;  %v38_v14 = vpop.permute.xlu1 %37  }
  0x7d   :  { %34 = vst.msk [vmem:[#allocation0] ss:$8 sm:$0x7] %vm33_vm5, %v32_v13  }
  0x7e   :  { %40 = vst.msk [vmem:[#allocation0] ss:$8 sm:$0x7] %vm39_vm6, %v38_v14  }
  0x80   :  { %v44_v15 = vpop.permute.xlu0 %43  }
  0x81   :  { %46 = vst.msk [vmem:[#allocation0] ss:$8 sm:$0x7] %vm45_vm7, %v44_v15  }
  0x88   :  { %v50_v16 = vld [vmem:[#allocation0] sm:$0x1]  ;;  %v54_v17 = vld [vmem:[#allocation0 + $0x8] sm:$0x1]  ;;  %v59_v18 = vld [vmem:[#allocation0 + $0x10] sm:$0x1] }
  0x89   :  { %52 = vst [vmem:[%s143_s1] sm:$0x1] %v50_v16  ;;  %79 = vst [vmem:[%s143_s1 + $0x1] sm:$0x1] %v54_v17 }
  0x8a   :  { %80 = vst [vmem:[%s143_s1 + $0x2] sm:$0x1] %v59_v18 }

// kernel: pg_forward.4
= control target key start
LH: loop header
LB: loop body
LE: loop exit
PB: predicated region body
PF: predicated region fallthrough
CT: control target
= control target key end

     0   :  { %s1346_s18 = smov 0   ;;  %s1863_s0 = inlined_call_operand.vmem [shape: f32[256,400], index: 0, kind: input, shape index: {}]   ;;  %s1864_s1 = inlined_call_operand.vmem [shape: f32[1,400], index: 1, kind: input, shape index: {}]   ;;  %s1865_s2 = inlined_call_operand.vmem [shape: f32[1,400], index: 2, kind: input, shape index: {}]   ;;  %s1866_s3 = inlined_call_operand.vmem [shape: f32[400,32], index: 3, kind: input, shape index: {}]   ;;  %s1867_s4 = inlined_call_operand.vmem [shape: f32[256,32], index: 4, kind: output, shape index: {0}]   ;;  %s1868_s5 = inlined_call_operand.vmem [shape: f32[2,2,32], index: 5, kind: output, shape index: {1}]  }
   0x1 LB: > { %s1352_s19 = sadd.s32 4294967295, %s1313_s18   ;;  %p1133_p0 = scmp.ge.s32.totalorder %s1313_s18, 1  ;;  %s1313_s18 = sphi %s1346_s18, %s16_s18  }
   0x2   : > { %p192_p1 = scmp.lt.s32.totalorder %s1313_s18, 3 }
   0x4   : > { %p193_p2 = pnand %p1133_p0, %p192_p1 }
   0x5   : > { %v558_v0 = vld [vmem:[%s1866_s3 + $0x80] sm:$0xff] (!%p193_p2)  ;;  %v559_v1 = vld [vmem:[%s1866_s3 + $0x88] sm:$0xff] (!%p193_p2)  ;;  %s1134_s26 = sshll.u32 (!%p193_p2), %s1352_s19, 4  ;;  %v1315_v3 = vmov (!%p193_p2), 0.0|0.0   ;;  %v560_v10 = vld [vmem:[%s1866_s3 + $0x90] sm:$0xff] (!%p193_p2)  ;;  %v308_v26 = vlaneseq (!%p193_p2)  ;;  %vm592_vm0 = vcmask (!%p193_p2), 130048  }
   0x6   : > { %196 = sbr.rel (%p193_p2) target bundleno = 337 (0x151), region = 36  ;;  %v574_v2 = vld [vmem:[%s1866_s3 + $0x100] sm:$0xff] (!%p193_p2)  ;;  %1271 = vmatprep.subr.bf16.mxu1 (!%p193_p2), %v1315_v3  ;;  %v1239_v4 = vpack.c.bf16 (!%p193_p2), %v559_v1, %v558_v0  ;;  %v575_v5 = vld [vmem:[%s1866_s3 + $0x108] sm:$0xff] (!%p193_p2)  ;;  %v561_v11 = vld [vmem:[%s1866_s3 + $0x98] sm:$0xff] (!%p193_p2)  ;;  %p1387_p3 = scmp.lt.s32.totalorder (!%p193_p2), %s1134_s26, 31  ;;  %vm931_vm1 = vcmask (!%p193_p2), 261120  }
   0x7   : > { %v542_v6 = vld [vmem:[%s1866_s3] sm:$0xff] (!%p193_p2)  ;;  %v543_v7 = vld [vmem:[%s1866_s3 + $0x8] sm:$0xff] (!%p193_p2)  ;;  %v1272_v8 = vpack.c.bf16 (!%p193_p2), %v575_v5, %v574_v2  ;;  %v576_v12 = vld [vmem:[%s1866_s3 + $0x110] sm:$0xff] (!%p193_p2)  ;;  %v1243_v13 = vpack.c.bf16 (!%p193_p2), %v561_v11, %v560_v10  ;;  %v1444_v36 = vshrl.u32 (!%p193_p2), %v308_v26, 7  ;;  %p238_p4 = scmp.lt.s32.totalorder (!%p193_p2), %s1352_s19, 1  ;;  %vm1038_vm2 = vcmask (!%p193_p2), 1040384  }
   0x8   : > { %v1241_v9 = vpack.c.bf16 (!%p193_p2), %v543_v7, %v542_v6  ;;  %1240 = vmatprep.subr.bf16.mxu0 (!%p193_p2), %v1239_v4  ;;  %v577_v14 = vld [vmem:[%s1866_s3 + $0x118] sm:$0xff] (!%p193_p2)  ;;  %v544_v15 = vld [vmem:[%s1866_s3 + $0x10] sm:$0xff] (!%p193_p2)  ;;  %v562_v19 = vld [vmem:[%s1866_s3 + $0xa0] sm:$0xff] (!%p193_p2)  ;;  %vm1040_vm3 = vcmask (!%p193_p2), 254976  }
   0x9   : > { %v545_v16 = vld [vmem:[%s1866_s3 + $0x18] sm:$0xff] (!%p193_p2)  ;;  %1273 = vmatpush1.bf16.msra.mxu1 (!%p193_p2), %v1272_v8  ;;  %v1275_v17 = vpack.c.bf16 (!%p193_p2), %v577_v14, %v576_v12  ;;  %v563_v20 = vld [vmem:[%s1866_s3 + $0xa8] sm:$0xff] (!%p193_p2)  ;;  %v578_v21 = vld [vmem:[%s1866_s3 + $0x120] sm:$0xff] (!%p193_p2)  ;;  %v314_v46 = vsub.s32 (!%p193_p2), 1, %v1444_v36  ;;  %v322_v49 = vsub.s32 (!%p193_p2), 3, %v1444_v36  ;;  %v310_v51 = vsub.s32 (!%p193_p2), 0, %v1444_v36 }
   0xa   : > { %1242 = vmatpush3.bf16.msra.mxu0 (!%p193_p2), %v1241_v9  ;;  %v1245_v18 = vpack.c.bf16 (!%p193_p2), %v545_v16, %v544_v15  ;;  %1274 = vmatprep.subr.bf16.mxu1 (!%p193_p2), %v1315_v3  ;;  %v1247_v22 = vpack.c.bf16 (!%p193_p2), %v563_v20, %v562_v19  ;;  %v579_v23 = vld [vmem:[%s1866_s3 + $0x128] sm:$0xff] (!%p193_p2)  ;;  %v546_v24 = vld [vmem:[%s1866_s3 + $0x20] sm:$0xff] (!%p193_p2)  ;;  %v564_v27 = vld [vmem:[%s1866_s3 + $0xb0] sm:$0xff] (!%p193_p2)  ;;  %v318_v7 = vsub.s32 (!%p193_p2), 2, %v1444_v36 }
   0xb   : > { %1244 = vmatprep.subr.bf16.mxu0 (!%p193_p2), %v1243_v13  ;;  %v547_v25 = vld [vmem:[%s1866_s3 + $0x28] sm:$0xff] (!%p193_p2)  ;;  %v565_v28 = vld [vmem:[%s1866_s3 + $0xb8] sm:$0xff] (!%p193_p2)  ;;  %v1278_v29 = vpack.c.bf16 (!%p193_p2), %v579_v23, %v578_v21  ;;  %v580_v31 = vld [vmem:[%s1866_s3 + $0x130] sm:$0xff] (!%p193_p2) }
   0xc   : > { %v1249_v30 = vpack.c.bf16 (!%p193_p2), %v547_v25, %v546_v24  ;;  %v1251_v32 = vpack.c.bf16 (!%p193_p2), %v565_v28, %v564_v27  ;;  %v581_v33 = vld [vmem:[%s1866_s3 + $0x138] sm:$0xff] (!%p193_p2)  ;;  %v548_v34 = vld [vmem:[%s1866_s3 + $0x30] sm:$0xff] (!%p193_p2)  ;;  %v566_v37 = vld [vmem:[%s1866_s3 + $0xc0] sm:$0xff] (!%p193_p2) }
   0xd   : > { %s1871_s26 = smov (!%p1387_p3, %s1134_s26), 31  ;;  %1276 = vmatpush1.bf16.msra.mxu1 %v1275_v17  ;;  %v549_v35 = vld [vmem:[%s1866_s3 + $0x38] sm:$0xff]  ;;  %v567_v38 = vld [vmem:[%s1866_s3 + $0xc8] sm:$0xff]  ;;  %v1281_v39 = vpack.c.bf16 %v581_v33, %v580_v31  ;;  %v582_v41 = vld [vmem:[%s1866_s3 + $0x140] sm:$0xff]  ;;  %s1873_s19 = smov (!%p238_p4, %s1352_s19), 1 }
   0xe   : > { %1246 = vmatpush3.bf16.msra.mxu0 %v1245_v18  ;;  %1277 = vmatprep.subr.bf16.mxu1 %v1315_v3  ;;  %s1158_s30 = sshll.u32 %s1871_s26, 5  ;;  %v1253_v40 = vpack.c.bf16 %v549_v35, %v548_v34  ;;  %v1255_v42 = vpack.c.bf16 %v567_v38, %v566_v37  ;;  %v583_v43 = vld [vmem:[%s1866_s3 + $0x148] sm:$0xff]  ;;  %v550_v44 = vld [vmem:[%s1866_s3 + $0x40] sm:$0xff]  ;;  %v568_v47 = vld [vmem:[%s1866_s3 + $0xd0] sm:$0xff] }
   0xf   : > { %1248 = vmatprep.subr.bf16.mxu0 %v1247_v22  ;;  %v551_v45 = vld [vmem:[%s1866_s3 + $0x48] sm:$0xff]  ;;  %s1469_s17 = scalar_lea.vmem %s1863_s0, %s1158_s30  ;;  %v569_v48 = vld [vmem:[%s1866_s3 + $0xd8] sm:$0xff]  ;;  %v584_v50 = vld [vmem:[%s1866_s3 + $0x150] sm:$0xff]  ;;  %v1284_v52 = vpack.c.bf16 %v583_v43, %v582_v41 }
  0x10   : > { %v1257_v53 = vpack.c.bf16 %v551_v45, %v550_v44  ;;  %v243_v54 = vld [vmem:[%s1469_s17 + $0x8] sm:$0xff]  ;;  %v306_v55 = vld [vmem:[%s1864_s1] sm:$0xf]  ;;  %v1259_v57 = vpack.c.bf16 %v569_v48, %v568_v47  ;;  %v585_v58 = vld [vmem:[%s1866_s3 + $0x158] sm:$0xff] }
  0x11   : > { %1279 = vmatpush1.bf16.msra.mxu1 %v1278_v29  ;;  %v1490_v56 = vld [vmem:[%s1865_s2] sm:$0xf]  ;;  %v552_v59 = vld [vmem:[%s1866_s3 + $0x50] sm:$0xff]  ;;  %v553_v60 = vld [vmem:[%s1866_s3 + $0x58] sm:$0xff]  ;;  %v1502_v61 = vrot.slane %v306_v55, %v314_v46  ;;  %v1514_v2 = vrot.slane %v306_v55, %v322_v49  ;;  %v1520_v6 = vrot.slane %v306_v55, %v310_v51  ;;  %v1287_v8 = vpack.c.bf16 %v585_v58, %v584_v50 }
  0x12   : > { %1250 = vmatpush3.bf16.msra.mxu0 %v1249_v30  ;;  %1280 = vmatprep.subr.bf16.mxu1 %v1315_v3  ;;  %v1505_v62 = vrot.slane %v1490_v56, %v314_v46  ;;  %v570_v63 = vld [vmem:[%s1866_s3 + $0xe0] sm:$0xff]  ;;  %v571_v0 = vld [vmem:[%s1866_s3 + $0xe8] sm:$0xff]  ;;  %v245_v1 = vld [vmem:[%s1469_s17 + $0x18] sm:$0xff]  ;;  %v1517_v4 = vrot.slane %v1490_v56, %v322_v49  ;;  %v1261_v9 = vpack.c.bf16 %v553_v60, %v552_v59 }
  0x13   : > { %1252 = vmatprep.subr.bf16.mxu0 %v1251_v32  ;;  %v329_v5 = vmul.f32 %v1502_v61, %v243_v54  ;;  %v586_v10 = vld [vmem:[%s1866_s3 + $0x160] sm:$0xff]  ;;  %v587_v11 = vld [vmem:[%s1866_s3 + $0x168] sm:$0xff]  ;;  %v331_v13 = vmul.f32 %v1514_v2, %v245_v1  ;;  %v1263_v14 = vpack.c.bf16 %v571_v0, %v570_v63  ;;  %v572_v19 = vld [vmem:[%s1866_s3 + $0xf0] sm:$0xff]  ;;  %v1561_v28 = vrot.slane %v1490_v56, %v310_v51 }
  0x14   : > { %v242_v12 = vld [vmem:[%s1469_s17] sm:$0xff]  ;;  %v555_v16 = vld [vmem:[%s1866_s3 + $0x68] sm:$0xff]  ;;  %v573_v20 = vld [vmem:[%s1866_s3 + $0xf8] sm:$0xff]  ;;  %v1563_v29 = vrot.slane %v306_v55, %v318_v7  ;;  %v1290_v30 = vpack.c.bf16 %v587_v11, %v586_v10  ;;  %v1581_v45 = vrot.slane %v1490_v56, %v318_v7 }
  0x15   : > { %1282 = vmatpush1.bf16.msra.mxu1 %v1281_v39  ;;  %v554_v15 = vld [vmem:[%s1866_s3 + $0x60] sm:$0xff]  ;;  %v415_v17 = vadd.f32 %v1505_v62, %v329_v5  ;;  %v247_v18 = vld [vmem:[%s1469_s17 + $0x28] sm:$0xff]  ;;  %v588_v21 = vld [vmem:[%s1866_s3 + $0x170] sm:$0xff]  ;;  %v417_v22 = vadd.f32 %v1517_v4, %v331_v13  ;;  %v328_v27 = vmul.f32 %v1520_v6, %v242_v12  ;;  %v1267_v36 = vpack.c.bf16 %v573_v20, %v572_v19 }
  0x16   : > { %1254 = vmatpush3.bf16.msra.mxu0 %v1253_v40  ;;  %1283 = vmatprep.subr.bf16.mxu1 %v1315_v3  ;;  %v589_v23 = vld [vmem:[%s1866_s3 + $0x178] sm:$0xff]  ;;  %v556_v24 = vld [vmem:[%s1866_s3 + $0x70] sm:$0xff]  ;;  %v1265_v31 = vpack.c.bf16 %v555_v16, %v554_v15  ;;  %v333_v33 = vmul.f32 %v1502_v61, %v247_v18  ;;  %v246_v35 = vld [vmem:[%s1469_s17 + $0x20] sm:$0xff] }
  0x17   : > { %1256 = vmatprep.subr.bf16.mxu0 %v1255_v42  ;;  %v557_v25 = vld [vmem:[%s1866_s3 + $0x78] sm:$0xff]  ;;  %v479_v26 = vmax.f32 %v415_v17, 0.0  ;;  %v481_v32 = vmax.f32 %v417_v22, 0.0  ;;  %v244_v34 = vld [vmem:[%s1469_s17 + $0x10] sm:$0xff]  ;;  %v251_v38 = vld [vmem:[%s1469_s17 + $0x48] sm:$0xff]  ;;  %v1293_v39 = vpack.c.bf16 %v589_v23, %v588_v21  ;;  %v414_v42 = vadd.f32 %v1561_v28, %v328_v27 }
  0x18   : > { %v249_v37 = vld [vmem:[%s1469_s17 + $0x38] sm:$0xff]  ;;  %v1269_v40 = vpack.c.bf16 %v557_v25, %v556_v24  ;;  %v590_v41 = vld [vmem:[%s1866_s3 + $0x180] sm:$0xff]  ;;  %v591_v43 = vld [vmem:[%s1866_s3 + $0x188] sm:$0xff]  ;;  %v330_v44 = vmul.f32 %v1563_v29, %v244_v34  ;;  %v332_v46 = vmul.f32 %v1520_v6, %v246_v35  ;;  %v419_v49 = vadd.f32 %v1505_v62, %v333_v33 }
  0x19   : > { %1285 = vmatpush1.bf16.msra.mxu1 %v1284_v52  ;;  %705 = vmatprep.mubr.f32.mxu0 %v479_v26  ;;  %v248_v47 = vld [vmem:[%s1469_s17 + $0x30] sm:$0xff]  ;;  %v250_v48 = vld [vmem:[%s1469_s17 + $0x40] sm:$0xff]  ;;  %v335_v50 = vmul.f32 %v1514_v2, %v249_v37  ;;  %v337_v51 = vmul.f32 %v1502_v61, %v251_v38  ;;  %v253_v52 = vld [vmem:[%s1469_s17 + $0x58] sm:$0xff]  ;;  %v1296_v54 = vpack.c.bf16 %v591_v43, %v590_v41 }
  0x1a   : > { %1258 = vmatpush3.bf16.msra.mxu0 %v1257_v53  ;;  %1286 = vmatprep.subr.bf16.mxu1 %v1315_v3  ;;  %v255_v53 = vld [vmem:[%s1469_s17 + $0x68] sm:$0xff]  ;;  %v334_v55 = vmul.f32 %v1563_v29, %v248_v47  ;;  %v336_v56 = vmul.f32 %v1520_v6, %v250_v48  ;;  %v416_v58 = vadd.f32 %v1581_v45, %v330_v44  ;;  %v252_v63 = vld [vmem:[%s1469_s17 + $0x50] sm:$0xff]  ;;  %v254_v0 = vld [vmem:[%s1469_s17 + $0x60] sm:$0xff]  ;;  %v483_v1 = vmax.f32 %v419_v49, 0.0 }
  0x1b   : > { %1260 = vmatprep.subr.bf16.mxu0 %v1259_v57  ;;  %1140 = vmatprep.mubr.msk.f32.mxu1 %vm592_vm0, %v481_v32  ;;  %v478_v57 = vmax.f32 %v414_v42, 0.0  ;;  %v418_v59 = vadd.f32 %v1561_v28, %v332_v46  ;;  %v339_v60 = vmul.f32 %v1514_v2, %v253_v52  ;;  %v421_v5 = vadd.f32 %v1517_v4, %v335_v50  ;;  %v259_v10 = vld [vmem:[%s1469_s17 + $0x88] sm:$0xff]  ;;  %v256_v22 = vld [vmem:[%s1469_s17 + $0x70] sm:$0xff]  ;;  %v258_v23 = vld [vmem:[%s1469_s17 + $0x80] sm:$0xff] }
  0x1c   : > { %v423_v7 = vadd.f32 %v1505_v62, %v337_v51  ;;  %v420_v11 = vadd.f32 %v1581_v45, %v334_v55  ;;  %v422_v12 = vadd.f32 %v1561_v28, %v336_v56  ;;  %v338_v13 = vmul.f32 %v1563_v29, %v252_v63  ;;  %v261_v24 = vld [vmem:[%s1469_s17 + $0x98] sm:$0xff]  ;;  %v263_v25 = vld [vmem:[%s1469_s17 + $0xa8] sm:$0xff]  ;;  %v262_v37 = vld [vmem:[%s1469_s17 + $0xa0] sm:$0xff] }
  0x1d   : > { %1288 = vmatpush1.bf16.msra.mxu1 %v1287_v8  ;;  %v341_v8 = vmul.f32 %v1502_v61, %v255_v53  ;;  %v480_v15 = vmax.f32 %v416_v58, 0.0  ;;  %v482_v16 = vmax.f32 %v418_v59, 0.0  ;;  %v425_v17 = vadd.f32 %v1517_v4, %v339_v60  ;;  %v265_v42 = vld [vmem:[%s1469_s17 + $0xb8] sm:$0xff]  ;;  %v267_v43 = vld [vmem:[%s1469_s17 + $0xc8] sm:$0xff]  ;;  %v264_v53 = vld [vmem:[%s1469_s17 + $0xb0] sm:$0xff] }
  0x1e   : > { %1262 = vmatpush3.bf16.msra.mxu0 %v1261_v9  ;;  %1289 = vmatprep.subr.bf16.mxu1 %v1315_v3  ;;  %v257_v9 = vld [vmem:[%s1469_s17 + $0x78] sm:$0xff]  ;;  %v485_v18 = vmax.f32 %v421_v5, 0.0  ;;  %v487_v19 = vmax.f32 %v423_v7, 0.0  ;;  %v345_v21 = vmul.f32 %v1502_v61, %v259_v10  ;;  %v484_v26 = vmax.f32 %v420_v11, 0.0  ;;  %v271_v60 = vld [vmem:[%s1469_s17 + $0xe8] sm:$0xff] }
  0x1f   : > { %1264 = vmatprep.subr.bf16.mxu0 %v1263_v14  ;;  %v340_v14 = vmul.f32 %v1520_v6, %v254_v0  ;;  %v427_v20 = vadd.f32 %v1505_v62, %v341_v8  ;;  %v486_v27 = vmax.f32 %v422_v12, 0.0  ;;  %v489_v32 = vmax.f32 %v425_v17, 0.0  ;;  %v269_v59 = vld [vmem:[%s1469_s17 + $0xd8] sm:$0xff] }
  0x20   : > { %v342_v34 = vmul.f32 %v1563_v29, %v256_v22  ;;  %v344_v35 = vmul.f32 %v1520_v6, %v258_v23  ;;  %v349_v41 = vmul.f32 %v1502_v61, %v263_v25  ;;  %v348_v48 = vmul.f32 %v1520_v6, %v262_v37  ;;  %v273_v17 = vld [vmem:[%s1469_s17 + $0xf8] sm:$0xff]  ;;  %v272_v22 = vld [vmem:[%s1469_s17 + $0xf0] sm:$0xff]  ;;  %v274_v23 = vld [vmem:[%s1469_s17 + $0x100] sm:$0xff] }
  0x21   : > { %1291 = vmatpush1.bf16.msra.mxu1 %v1290_v30  ;;  %v424_v30 = vadd.f32 %v1581_v45, %v338_v13  ;;  %v491_v38 = vmax.f32 %v427_v20, 0.0  ;;  %v351_v52 = vmul.f32 %v1514_v2, %v265_v42  ;;  %v353_v58 = vmul.f32 %v1502_v61, %v267_v43  ;;  %v279_v37 = vld [vmem:[%s1469_s17 + $0x128] sm:$0xff] }
  0x22   : > { %1266 = vmatpush3.bf16.msra.mxu0 %v1265_v31  ;;  %1292 = vmatprep.subr.bf16.mxu1 %v1315_v3  ;;  %v426_v31 = vadd.f32 %v1561_v28, %v340_v14  ;;  %v428_v50 = vadd.f32 %v1581_v45, %v342_v34  ;;  %v430_v51 = vadd.f32 %v1561_v28, %v344_v35  ;;  %v277_v34 = vld [vmem:[%s1469_s17 + $0x118] sm:$0xff] }
  0x23   : > { %1268 = vmatprep.subr.bf16.mxu0 %v1267_v36  ;;  %v260_v36 = vld [vmem:[%s1469_s17 + $0x90] sm:$0xff]  ;;  %v488_v44 = vmax.f32 %v424_v30, 0.0  ;;  %v434_v0 = vadd.f32 %v1561_v28, %v348_v48  ;;  %v355_v10 = vmul.f32 %v1514_v2, %v269_v59  ;;  %v439_v13 = vadd.f32 %v1505_v62, %v353_v58 }
  0x24   : > { %v490_v46 = vmax.f32 %v426_v31, 0.0  ;;  %v346_v47 = vmul.f32 %v1563_v29, %v260_v36  ;;  %v492_v7 = vmax.f32 %v428_v50, 0.0  ;;  %v494_v8 = vmax.f32 %v430_v51, 0.0 }
  0x25   : > { %1294 = vmatpush1.bf16.msra.mxu1 %v1293_v39  ;;  %v431_v39 = vadd.f32 %v1505_v62, %v345_v21  ;;  %v357_v14 = vmul.f32 %v1502_v61, %v271_v60  ;;  %v441_v25 = vadd.f32 %v1517_v4, %v355_v10  ;;  %v503_v30 = vmax.f32 %v439_v13, 0.0  ;;  %v282_v10 = vld [vmem:[%s1469_s17 + $0x140] sm:$0xff] }
  0x26   : > { %1270 = vmatpush3.bf16.msra.mxu0 %v1269_v40  ;;  %1295 = vmatprep.subr.bf16.mxu1 %v1315_v3  ;;  %v343_v3 = vmul.f32 %v1514_v2, %v257_v9  ;;  %v347_v40 = vmul.f32 %v1514_v2, %v261_v24  ;;  %v432_v63 = vadd.f32 %v1581_v45, %v346_v47  ;;  %v281_v47 = vld [vmem:[%s1469_s17 + $0x138] sm:$0xff] }
  0x27   : > { %v495_v55 = vmax.f32 %v431_v39, 0.0  ;;  %v437_v9 = vadd.f32 %v1517_v4, %v351_v52  ;;  %v443_v31 = vadd.f32 %v1505_v62, %v357_v14  ;;  %v358_v35 = vmul.f32 %v1563_v29, %v272_v22  ;;  %v283_v52 = vld [vmem:[%s1469_s17 + $0x148] sm:$0xff] }
  0x28   : > { %v429_v33 = vadd.f32 %v1517_v4, %v343_v3  ;;  %v433_v56 = vadd.f32 %v1517_v4, %v347_v40  ;;  %v275_v3 = vld [vmem:[%s1469_s17 + $0x108] sm:$0xff]  ;;  %v360_v36 = vmul.f32 %v1520_v6, %v274_v23  ;;  %v276_v40 = vld [vmem:[%s1469_s17 + $0x110] sm:$0xff]  ;;  %v505_v42 = vmax.f32 %v441_v25, 0.0 }
  0x29   : > { %706 = vmatmul.mubr.f32.vlgmr.msra.gmra.mrb[0].mxu0 %v478_v57  ;;  %1297 = vmatpush1.bf16.msra.mxu1 %v1296_v54  ;;  %v266_v54 = vld [vmem:[%s1469_s17 + $0xc0] sm:$0xff]  ;;  %v435_v57 = vadd.f32 %v1505_v62, %v349_v41  ;;  %v501_v24 = vmax.f32 %v437_v9, 0.0  ;;  %v507_v48 = vmax.f32 %v443_v31, 0.0  ;;  %v365_v51 = vmul.f32 %v1502_v61, %v279_v37  ;;  %v284_v25 = vld [vmem:[%s1469_s17 + $0x150] sm:$0xff]  ;;  %v289_v31 = vld [vmem:[%s1469_s17 + $0x178] sm:$0xff] }
  0x2a   : > { %710 = vmatprep.mubr.f32.mxu0 %v483_v1  ;;  %v493_v49 = vmax.f32 %v429_v33, 0.0  ;;  %v350_v1 = vmul.f32 %v1563_v29, %v264_v53  ;;  %v352_v5 = vmul.f32 %v1520_v6, %v266_v54  ;;  %v497_v11 = vmax.f32 %v433_v56, 0.0  ;;  %v278_v41 = vld [vmem:[%s1469_s17 + $0x120] sm:$0xff] }
  0x2b   : > { %v499_v12 = vmax.f32 %v435_v57, 0.0  ;;  %v361_v33 = vmul.f32 %v1502_v61, %v275_v3  ;;  %v444_v53 = vadd.f32 %v1581_v45, %v358_v35  ;;  %v446_v54 = vadd.f32 %v1561_v28, %v360_v36  ;;  %v291_v35 = vld [vmem:[%s1469_s17 + $0x188] sm:$0xff] }
  0x2c   : > { %851 = vmatmul.mubr.f32.vlgmr.msra.gmra.mrb[0].mxu1 %v480_v15  ;;  %v268_v15 = vld [vmem:[%s1469_s17 + $0xd0] sm:$0xff]  ;;  %v436_v20 = vadd.f32 %v1581_v45, %v350_v1  ;;  %v438_v21 = vadd.f32 %v1561_v28, %v352_v5  ;;  %v364_v56 = vmul.f32 %v1520_v6, %v278_v41  ;;  %v367_v57 = vmul.f32 %v1514_v2, %v281_v47  ;;  %v301_v1 = vld [vmem:[%s1469_s17 + $0x1d8] sm:$0xff]  ;;  %v303_v5 = vld [vmem:[%s1469_s17 + $0x1e8] sm:$0xff] }
  0x2d   : > { %711 = vmatmul.mubr.f32.gmra.mrb[2].mxu0 %v482_v16  ;;  %1141 = vmatprep.mubr.msk.f32.mxu1 %vm592_vm0, %v485_v18  ;;  %v270_v16 = vld [vmem:[%s1469_s17 + $0xe0] sm:$0xff]  ;;  %v496_v18 = vmax.f32 %v432_v63, 0.0  ;;  %v447_v50 = vadd.f32 %v1505_v62, %v361_v33  ;;  %v369_v63 = vmul.f32 %v1502_v61, %v283_v52  ;;  %v451_v9 = vadd.f32 %v1505_v62, %v365_v51  ;;  %v293_v52 = vld [vmem:[%s1469_s17 + $0x198] sm:$0xff] }
  0x2e   : > { %715 = vmatprep.mubr.f32.mxu0 %v487_v19  ;;  %v498_v19 = vmax.f32 %v434_v0, 0.0  ;;  %v502_v39 = vmax.f32 %v438_v21, 0.0  ;;  %v280_v0 = vld [vmem:[%s1469_s17 + $0x130] sm:$0xff]  ;;  %v510_v13 = vmax.f32 %v446_v54, 0.0  ;;  %v368_v23 = vmul.f32 %v1520_v6, %v282_v10  ;;  %v290_v51 = vld [vmem:[%s1469_s17 + $0x180] sm:$0xff]  ;;  %v297_v10 = vld [vmem:[%s1469_s17 + $0x1b8] sm:$0xff] }
  0x2f   : > { %v366_v3 = vmul.f32 %v1563_v29, %v280_v0  ;;  %v455_v22 = vadd.f32 %v1505_v62, %v369_v63  ;;  %v379_v63 = vmul.f32 %v1514_v2, %v293_v52  ;;  %v292_v0 = vld [vmem:[%s1469_s17 + $0x190] sm:$0xff] }
  0x30   : > { %856 = vmatmul.mubr.f32.gmra.mrb[2].mxu1 %v484_v26  ;;  %v354_v26 = vmul.f32 %v1563_v29, %v268_v15  ;;  %v450_v15 = vadd.f32 %v1561_v28, %v364_v56 }
  0x31   : > { %716 = vmatmul.mubr.f32.gmra.mrb[4].mxu0 %v486_v27  ;;  %1142 = vmatprep.mubr.msk.f32.mxu1 %vm592_vm0, %v489_v32  ;;  %v356_v27 = vmul.f32 %v1520_v6, %v270_v16  ;;  %v359_v32 = vmul.f32 %v1514_v2, %v273_v17  ;;  %v287_v16 = vld [vmem:[%s1469_s17 + $0x168] sm:$0xff]  ;;  %v453_v17 = vadd.f32 %v1517_v4, %v367_v57  ;;  %v519_v47 = vmax.f32 %v455_v22, 0.0 }
  0x32   : > { %720 = vmatprep.mubr.f32.mxu0 %v491_v38  ;;  %v500_v38 = vmax.f32 %v436_v20, 0.0  ;;  %v440_v43 = vadd.f32 %v1581_v45, %v354_v26  ;;  %v305_v20 = vld [vmem:[%s1469_s17 + $0x1f8] sm:$0xff]  ;;  %v286_v26 = vld [vmem:[%s1469_s17 + $0x160] sm:$0xff]  ;;  %v514_v37 = vmax.f32 %v450_v15, 0.0  ;;  %v378_v15 = vmul.f32 %v1563_v29, %v292_v0 }
  0x33   : > { %v391_v36 = vmul.f32 %v1514_v2, %v305_v20  ;;  %v517_v41 = vmax.f32 %v453_v17, 0.0  ;;  %v383_v22 = vmul.f32 %v1514_v2, %v297_v10 }
  0x34   : > { %861 = vmatmul.mubr.f32.gmra.mrb[4].mxu1 %v488_v44  ;;  %v442_v44 = vadd.f32 %v1561_v28, %v356_v27  ;;  %v504_v58 = vmax.f32 %v440_v43, 0.0  ;;  %v515_v27 = vmax.f32 %v451_v9, 0.0  ;;  %v375_v43 = vmul.f32 %v1514_v2, %v289_v31  ;;  %v294_v9 = vld [vmem:[%s1469_s17 + $0x1a0] sm:$0xff] }
  0x35   : > { %721 = vmatmul.mubr.f32.gmra.mrb[6].mxu0 %v490_v46  ;;  %1143 = vmatprep.mubr.msk.f32.mxu1 %vm592_vm0, %v493_v49  ;;  %v363_v46 = vmul.f32 %v1514_v2, %v277_v34  ;;  %v445_v49 = vadd.f32 %v1517_v4, %v359_v32 }
  0x36   : > { %725 = vmatprep.mubr.f32.mxu0 %v495_v55  ;;  %v362_v55 = vmul.f32 %v1563_v29, %v276_v40  ;;  %v506_v59 = vmax.f32 %v442_v44, 0.0  ;;  %v372_v40 = vmul.f32 %v1520_v6, %v286_v26  ;;  %v288_v44 = vld [vmem:[%s1469_s17 + $0x170] sm:$0xff] }
  0x37   : > { %v449_v60 = vadd.f32 %v1517_v4, %v363_v46  ;;  %v1727_v46 = vadd.f32 %v1517_v4, %v391_v36  ;;  %v374_v57 = vmul.f32 %v1563_v29, %v288_v44 }
  0x38   : > { %866 = vmatmul.mubr.f32.gmra.mrb[6].mxu1 %v492_v7  ;;  %v509_v7 = vmax.f32 %v445_v49, 0.0  ;;  %v448_v14 = vadd.f32 %v1581_v45, %v362_v55  ;;  %v458_v56 = vadd.f32 %v1561_v28, %v372_v40 }
  0x39   : > { %726 = vmatmul.mubr.f32.gmra.mrb[8].mxu0 %v494_v8  ;;  %1144 = vmatprep.mubr.msk.f32.mxu1 %vm592_vm0, %v497_v11  ;;  %v511_v8 = vmax.f32 %v447_v50, 0.0  ;;  %v285_v11 = vld [vmem:[%s1469_s17 + $0x158] sm:$0xff]  ;;  %v513_v21 = vmax.f32 %v449_v60, 0.0  ;;  %v377_v50 = vmul.f32 %v1502_v61, %v291_v35  ;;  %v376_v60 = vmul.f32 %v1520_v6, %v290_v51 }
  0x3a   : > { %730 = vmatprep.mubr.f32.mxu0 %v499_v12  ;;  %v508_v12 = vmax.f32 %v444_v53, 0.0  ;;  %v512_v34 = vmax.f32 %v448_v14, 0.0  ;;  %v295_v53 = vld [vmem:[%s1469_s17 + $0x1a8] sm:$0xff]  ;;  %v460_v14 = vadd.f32 %v1581_v45, %v374_v57  ;;  %v469_v35 = vadd.f32 %v1517_v4, %v383_v22 }
  0x3b   : > { %v462_v17 = vadd.f32 %v1561_v28, %v376_v60 }
  0x3c   : > { %871 = vmatmul.mubr.f32.gmra.mrb[8].mxu1 %v496_v18  ;;  %v387_v18 = vmul.f32 %v1514_v2, %v301_v1 }
  0x3d   : > { %731 = vmatmul.mubr.f32.gmra.mrb[10].mxu0 %v498_v19  ;;  %1145 = vmatprep.mubr.msk.f32.mxu1 %vm592_vm0, %v501_v24  ;;  %v389_v19 = vmul.f32 %v1502_v61, %v303_v5  ;;  %v371_v24 = vmul.f32 %v1514_v2, %v285_v11  ;;  %v299_v11 = vld [vmem:[%s1469_s17 + $0x1c8] sm:$0xff] }
  0x3e   : > { %735 = vmatprep.mubr.f32.mxu0 %v503_v30  ;;  %v373_v30 = vmul.f32 %v1502_v61, %v287_v16  ;;  %v1713_v32 = vadd.f32 %v1517_v4, %v387_v18  ;;  %v380_v18 = vmul.f32 %v1520_v6, %v294_v9 }
  0x3f   : > { %v1716_v33 = vadd.f32 %v1505_v62, %v389_v19  ;;  %v296_v19 = vld [vmem:[%s1469_s17 + $0x1b0] sm:$0xff] }
  0x40   : > { %876 = vmatmul.mubr.f32.gmra.mrb[10].mxu1 %v500_v38  ;;  %v452_v38 = vadd.f32 %v1581_v45, %v366_v3  ;;  %v459_v49 = vadd.f32 %v1505_v62, %v373_v30  ;;  %v465_v3 = vadd.f32 %v1517_v4, %v379_v63  ;;  %v382_v26 = vmul.f32 %v1563_v29, %v296_v19 }
  0x41   : > { %736 = vmatmul.mubr.f32.gmra.mrb[12].mxu0 %v502_v39  ;;  %1146 = vmatprep.mubr.msk.f32.mxu1 %vm592_vm0, %v505_v42  ;;  %v370_v39 = vmul.f32 %v1563_v29, %v284_v25  ;;  %v454_v42 = vadd.f32 %v1561_v28, %v368_v23  ;;  %v385_v23 = vmul.f32 %v1502_v61, %v299_v11  ;;  %v526_v30 = vmax.f32 %v462_v17, 0.0 }
  0x42   : > { %740 = vmatprep.mubr.f32.mxu0 %v507_v48  ;;  %v457_v48 = vadd.f32 %v1517_v4, %v371_v24  ;;  %v516_v54 = vmax.f32 %v452_v38, 0.0  ;;  %v523_v5 = vmax.f32 %v459_v49, 0.0  ;;  %v298_v24 = vld [vmem:[%s1469_s17 + $0x1c0] sm:$0xff]  ;;  %v464_v25 = vadd.f32 %v1581_v45, %v378_v15 }
  0x43   : > { %v456_v55 = vadd.f32 %v1581_v45, %v370_v39  ;;  %v466_v31 = vadd.f32 %v1561_v28, %v380_v18  ;;  %v529_v2 = vmax.f32 %v465_v3, 0.0  ;;  %v471_v36 = vadd.f32 %v1505_v62, %v385_v23  ;;  %v302_v38 = vld [vmem:[%s1469_s17 + $0x1e0] sm:$0xff] }
  0x44   : > { %881 = vmatmul.mubr.f32.gmra.mrb[12].mxu1 %v504_v58  ;;  %v518_v58 = vmax.f32 %v454_v42, 0.0  ;;  %v521_v1 = vmax.f32 %v457_v48, 0.0  ;;  %v528_v39 = vmax.f32 %v464_v25, 0.0  ;;  %v468_v40 = vadd.f32 %v1581_v45, %v382_v26 }
  0x45   : > { %741 = vmatmul.mubr.f32.gmra.mrb[14].mxu0 %v506_v59  ;;  %1147 = vmatprep.mubr.msk.f32.mxu1 %vm592_vm0, %v509_v7  ;;  %v461_v59 = vadd.f32 %v1517_v4, %v375_v43  ;;  %v463_v7 = vadd.f32 %v1505_v62, %v377_v50  ;;  %v388_v44 = vmul.f32 %v1520_v6, %v302_v38  ;;  %v533_v4 = vmax.f32 %v469_v35, 0.0 }
  0x46   : > { %745 = vmatprep.mubr.f32.mxu0 %v511_v8  ;;  %v381_v8 = vmul.f32 %v1502_v61, %v295_v53  ;;  %v532_v48 = vmax.f32 %v468_v40, 0.0  ;;  %v539_v53 = vmax.f32 %v1716_v33, 0.0 }
  0x47   : > { %v525_v16 = vmax.f32 %v461_v59, 0.0  ;;  %v527_v20 = vmax.f32 %v463_v7, 0.0  ;;  %v474_v51 = vadd.f32 %v1561_v28, %v388_v44 }
  0x48   : > { %886 = vmatmul.mubr.f32.gmra.mrb[14].mxu1 %v508_v12  ;;  %v520_v12 = vmax.f32 %v456_v55, 0.0 }
  0x49   : > { %746 = vmatmul.mubr.f32.gmra.mrb[16].mxu0 %v510_v13  ;;  %1148 = vmatprep.mubr.msk.f32.mxu1 %vm592_vm0, %v513_v21  ;;  %v522_v13 = vmax.f32 %v458_v56, 0.0  ;;  %v467_v21 = vadd.f32 %v1505_v62, %v381_v8  ;;  %v304_v62 = vld [vmem:[%s1469_s17 + $0x1f0] sm:$0xff]  ;;  %v538_v55 = vmax.f32 %v474_v51, 0.0 }
  0x4a   : > { %750 = vmatprep.mubr.f32.mxu0 %v515_v27  ;;  %v524_v27 = vmax.f32 %v460_v14, 0.0  ;;  %v390_v52 = vmul.f32 %v1563_v29, %v304_v62 }
  0x4b   : > { %v531_v61 = vmax.f32 %v467_v21, 0.0 }
  0x4c   : > { %891 = vmatmul.mubr.f32.gmra.mrb[16].mxu1 %v512_v34  ;;  %v384_v34 = vmul.f32 %v1520_v6, %v298_v24  ;;  %v537_v6 = vmax.f32 %v1713_v32, 0.0  ;;  %v476_v56 = vadd.f32 %v1581_v45, %v390_v52 }
  0x4d   : > { %751 = vmatmul.mubr.f32.gmra.mrb[18].mxu0 %v514_v37  ;;  %1149 = vmatprep.mubr.msk.f32.mxu1 %vm592_vm0, %v517_v41  ;;  %v300_v37 = vld [vmem:[%s1469_s17 + $0x1d0] sm:$0xff]  ;;  %v530_v41 = vmax.f32 %v466_v31, 0.0  ;;  %s1138_s17 = sshll.u32 %s1871_s26, 3  ;;  %s1139_s26 = sshll.u32 %s1873_s19, 1 }
  0x4e   : > { %755 = vmatprep.mubr.f32.mxu0 %v519_v47  ;;  %v470_v42 = vadd.f32 %v1561_v28, %v384_v34  ;;  %v386_v43 = vmul.f32 %v1563_v29, %v300_v37  ;;  %v535_v47 = vmax.f32 %v471_v36, 0.0  ;;  %v541_v28 = vmax.f32 %v1727_v46, 0.0  ;;  %s1789_s23 = scalar_lea.vmem %s1867_s4, %s1138_s17  ;;  %s241_s27 = scalar_lea.vmem %s1868_s5, %s1139_s26 }
  0x4f   : > { %v540_v29 = vmax.f32 %v476_v56, 0.0 }
  0x50   : > { %896 = vmatmul.mubr.f32.gmra.mrb[18].mxu1 %v516_v54  ;;  %v534_v49 = vmax.f32 %v470_v42, 0.0  ;;  %v472_v50 = vadd.f32 %v1581_v45, %v386_v43 }
  0x51   : > { %756 = vmatmul.mubr.f32.gmra.mrb[20].mxu0 %v518_v58  ;;  %1150 = vmatprep.mubr.msk.f32.mxu1 %vm592_vm0, %v521_v1 }
  0x52   : > { %760 = vmatprep.mubr.f32.mxu0 %v523_v5  ;;  %v536_v54 = vmax.f32 %v472_v50, 0.0 }
  0x54   : > { %901 = vmatmul.mubr.f32.gmra.mrb[20].mxu1 %v520_v12 }
  0x55   : > { %761 = vmatmul.mubr.f32.gmra.mrb[22].mxu0 %v522_v13  ;;  %1151 = vmatprep.mubr.msk.f32.mxu1 %vm592_vm0, %v525_v16 }
  0x56   : > { %765 = vmatprep.mubr.f32.mxu0 %v527_v20 }
  0x58   : > { %906 = vmatmul.mubr.f32.gmra.mrb[22].mxu1 %v524_v27 }
  0x59   : > { %766 = vmatmul.mubr.f32.gmra.mrb[24].mxu0 %v526_v30  ;;  %1152 = vmatprep.mubr.msk.f32.mxu1 %vm592_vm0, %v529_v2 }
  0x5a   : > { %770 = vmatprep.mubr.f32.mxu0 %v531_v61 }
  0x5c   : > { %911 = vmatmul.mubr.f32.gmra.mrb[24].mxu1 %v528_v39 }
  0x5d   : > { %771 = vmatmul.mubr.f32.gmra.mrb[26].mxu0 %v530_v41  ;;  %1153 = vmatprep.mubr.msk.f32.mxu1 %vm592_vm0, %v533_v4 }
  0x5e   : > { %775 = vmatprep.mubr.f32.mxu0 %v535_v47 }
  0x60   : > { %916 = vmatmul.mubr.f32.gmra.mrb[26].mxu1 %v532_v48 }
  0x61   : > { %776 = vmatmul.mubr.f32.gmra.mrb[28].mxu0 %v534_v49  ;;  %1154 = vmatprep.mubr.msk.f32.mxu1 %vm592_vm0, %v537_v6 }
  0x62   : > { %780 = vmatprep.mubr.f32.mxu0 %v539_v53 }
  0x64   : > { %921 = vmatmul.mubr.f32.gmra.mrb[28].mxu1 %v536_v54 }
  0x65   : > { %781 = vmatmul.mubr.f32.gmra.mrb[30].mxu0 %v538_v55  ;;  %1155 = vmatprep.mubr.msk.f32.mxu1 %vm592_vm0, %v541_v28 }
  0x68   : > { %926 = vmatmul.mubr.f32.gmra.mrb[30].mxu1 %v540_v29 }
  0xfc   : > { %v1191_v32 = vpop.f32.mrb[0].mxu0 }
  0xfd   : > { %v1192_v33 = vpop.f32.mrb[1].mxu0 }
  0xfe   : > { %v1193_v57 = vadd.f32 %v1192_v33, %v1191_v32 }
  0xff   : > { %v852_v45 = vpop.f32.mrb[0].mxu1 }
 0x100   : > { %v1194_v46 = vpop.f32.mrb[2].mxu0  ;;  %v853_v58 = vadd.f32 %v1193_v57, %v852_v45  ;;  %v854_v59 = vpop.f32.mrb[1].mxu1 }
 0x101   : > { %v1195_v60 = vpop.f32.mrb[3].mxu0 }
 0x102   : > { %v1196_v63 = vadd.f32 %v1195_v60, %v1194_v46  ;;  %932 = vst.msk [vmem:[%s1789_s23] sm:$0xff] %vm931_vm1, %v853_v58  ;;  %v985_v5 = vmul.f32 %v853_v58, %v853_v58  ;;  %v948_v11 = vsel %vm931_vm1, %v853_v58, 0.0 }
 0x103   : > { %v857_v0 = vpop.f32.mrb[2].mxu1 }
 0x104   : > { %v1197_v1 = vpop.f32.mrb[4].mxu0  ;;  %v858_v7 = vadd.f32 %v1196_v63, %v857_v0  ;;  %v859_v8 = vpop.f32.mrb[3].mxu1  ;;  %v1001_v17 = vsel %vm931_vm1, %v985_v5, 0.0 }
 0x105   : > { %v1198_v9 = vpop.f32.mrb[5].mxu0 }
 0x106   : > { %v1199_v10 = vadd.f32 %v1198_v9, %v1197_v1  ;;  %933 = vst.msk [vmem:[%s1789_s23 + $0x8] sm:$0xff] %vm931_vm1, %v858_v7  ;;  %v949_v12 = vsel %vm931_vm1, %v858_v7, 0.0  ;;  %v986_v13 = vmul.f32 %v858_v7, %v858_v7 }
 0x107   : > { %v950_v14 = vadd.f32 %v949_v12, %v948_v11  ;;  %v862_v15 = vpop.f32.mrb[4].mxu1 }
 0x108   : > { %v1200_v16 = vpop.f32.mrb[6].mxu0  ;;  %v1002_v3 = vsel %vm931_vm1, %v986_v13, 0.0  ;;  %v863_v18 = vadd.f32 %v1199_v10, %v862_v15  ;;  %v864_v19 = vpop.f32.mrb[5].mxu1 }
 0x109   : > { %v1201_v20 = vpop.f32.mrb[7].mxu0  ;;  %v1003_v21 = vadd.f32 %v1002_v3, %v1001_v17 }
 0x10a   : > { %v1202_v22 = vadd.f32 %v1201_v20, %v1200_v16  ;;  %934 = vst.msk [vmem:[%s1789_s23 + $0x10] sm:$0xff] %vm931_vm1, %v863_v18  ;;  %v951_v23 = vsel %vm931_vm1, %v863_v18, 0.0  ;;  %v987_v24 = vmul.f32 %v863_v18, %v863_v18 }
 0x10b   : > { %v952_v25 = vadd.f32 %v951_v23, %v950_v14  ;;  %v867_v26 = vpop.f32.mrb[6].mxu1 }
 0x10c   : > { %v1203_v27 = vpop.f32.mrb[8].mxu0  ;;  %v1004_v30 = vsel %vm931_vm1, %v987_v24, 0.0  ;;  %v868_v31 = vadd.f32 %v1202_v22, %v867_v26  ;;  %v869_v34 = vpop.f32.mrb[7].mxu1 }
 0x10d   : > { %v1204_v2 = vpop.f32.mrb[9].mxu0  ;;  %v1005_v61 = vadd.f32 %v1004_v30, %v1003_v21 }
 0x10e   : > { %v1205_v35 = vadd.f32 %v1204_v2, %v1203_v27  ;;  %935 = vst.msk [vmem:[%s1789_s23 + $0x18] sm:$0xff] %vm931_vm1, %v868_v31  ;;  %v953_v36 = vsel %vm931_vm1, %v868_v31, 0.0  ;;  %v988_v37 = vmul.f32 %v868_v31, %v868_v31 }
 0x10f   : > { %v954_v38 = vadd.f32 %v953_v36, %v952_v25  ;;  %v872_v39 = vpop.f32.mrb[8].mxu1 }
 0x110   : > { %v1206_v40 = vpop.f32.mrb[10].mxu0  ;;  %v1006_v41 = vsel %vm931_vm1, %v988_v37, 0.0  ;;  %v873_v42 = vadd.f32 %v1205_v35, %v872_v39  ;;  %v874_v43 = vpop.f32.mrb[9].mxu1 }
 0x111   : > { %v1207_v44 = vpop.f32.mrb[11].mxu0  ;;  %v1007_v4 = vadd.f32 %v1006_v41, %v1005_v61 }
 0x112   : > { %v1208_v47 = vadd.f32 %v1207_v44, %v1206_v40  ;;  %936 = vst.msk [vmem:[%s1789_s23 + $0x20] sm:$0xff] %vm931_vm1, %v873_v42  ;;  %v955_v62 = vsel %vm931_vm1, %v873_v42, 0.0  ;;  %v989_v48 = vmul.f32 %v873_v42, %v873_v42 }
 0x113   : > { %v956_v49 = vadd.f32 %v955_v62, %v954_v38  ;;  %v877_v50 = vpop.f32.mrb[10].mxu1 }
 0x114   : > { %v1209_v51 = vpop.f32.mrb[12].mxu0  ;;  %v1008_v52 = vsel %vm931_vm1, %v989_v48, 0.0  ;;  %v878_v6 = vadd.f32 %v1208_v47, %v877_v50  ;;  %v879_v53 = vpop.f32.mrb[11].mxu1 }
 0x115   : > { %v1210_v54 = vpop.f32.mrb[13].mxu0  ;;  %v1009_v55 = vadd.f32 %v1008_v52, %v1007_v4 }
 0x116   : > { %v1211_v56 = vadd.f32 %v1210_v54, %v1209_v51  ;;  %937 = vst.msk [vmem:[%s1789_s23 + $0x28] sm:$0xff] %vm931_vm1, %v878_v6  ;;  %v957_v28 = vsel %vm931_vm1, %v878_v6, 0.0  ;;  %v990_v29 = vmul.f32 %v878_v6, %v878_v6 }
 0x117   : > { %v958_v32 = vadd.f32 %v957_v28, %v956_v49  ;;  %v882_v33 = vpop.f32.mrb[12].mxu1 }
 0x118   : > { %v1212_v57 = vpop.f32.mrb[14].mxu0  ;;  %v1010_v45 = vsel %vm931_vm1, %v990_v29, 0.0  ;;  %v883_v46 = vadd.f32 %v1211_v56, %v882_v33  ;;  %v884_v58 = vpop.f32.mrb[13].mxu1 }
 0x119   : > { %v1213_v59 = vpop.f32.mrb[15].mxu0  ;;  %v1011_v60 = vadd.f32 %v1010_v45, %v1009_v55 }
 0x11a   : > { %v1214_v63 = vadd.f32 %v1213_v59, %v1212_v57  ;;  %938 = vst.msk [vmem:[%s1789_s23 + $0x30] sm:$0xff] %vm931_vm1, %v883_v46  ;;  %v959_v0 = vsel %vm931_vm1, %v883_v46, 0.0  ;;  %v991_v1 = vmul.f32 %v883_v46, %v883_v46 }
 0x11b   : > { %v960_v5 = vadd.f32 %v959_v0, %v958_v32  ;;  %v887_v7 = vpop.f32.mrb[14].mxu1 }
 0x11c   : > { %v1215_v8 = vpop.f32.mrb[16].mxu0  ;;  %v1012_v9 = vsel %vm931_vm1, %v991_v1, 0.0  ;;  %v888_v10 = vadd.f32 %v1214_v63, %v887_v7  ;;  %v889_v11 = vpop.f32.mrb[15].mxu1 }
 0x11d   : > { %v1216_v12 = vpop.f32.mrb[17].mxu0  ;;  %v1013_v13 = vadd.f32 %v1012_v9, %v1011_v60 }
 0x11e   : > { %v1217_v14 = vadd.f32 %v1216_v12, %v1215_v8  ;;  %939 = vst.msk [vmem:[%s1789_s23 + $0x38] sm:$0xff] %vm931_vm1, %v888_v10  ;;  %v961_v15 = vsel %vm931_vm1, %v888_v10, 0.0  ;;  %v992_v16 = vmul.f32 %v888_v10, %v888_v10 }
 0x11f   : > { %v962_v17 = vadd.f32 %v961_v15, %v960_v5  ;;  %v892_v3 = vpop.f32.mrb[16].mxu1 }
 0x120   : > { %v1218_v18 = vpop.f32.mrb[18].mxu0  ;;  %v1014_v19 = vsel %vm931_vm1, %v992_v16, 0.0  ;;  %v893_v20 = vadd.f32 %v1217_v14, %v892_v3  ;;  %v894_v21 = vpop.f32.mrb[17].mxu1 }
 0x121   : > { %v1219_v22 = vpop.f32.mrb[19].mxu0  ;;  %v1015_v23 = vadd.f32 %v1014_v19, %v1013_v13 }
 0x122   : > { %v1220_v24 = vadd.f32 %v1219_v22, %v1218_v18  ;;  %940 = vst.msk [vmem:[%s1789_s23 + $0x40] sm:$0xff] %vm931_vm1, %v893_v20  ;;  %v963_v25 = vsel %vm931_vm1, %v893_v20, 0.0  ;;  %v993_v26 = vmul.f32 %v893_v20, %v893_v20 }
 0x123   : > { %v964_v27 = vadd.f32 %v963_v25, %v962_v17  ;;  %v897_v30 = vpop.f32.mrb[18].mxu1 }
 0x124   : > { %v1221_v31 = vpop.f32.mrb[20].mxu0  ;;  %v1016_v34 = vsel %vm931_vm1, %v993_v26, 0.0  ;;  %v898_v2 = vadd.f32 %v1220_v24, %v897_v30  ;;  %v899_v61 = vpop.f32.mrb[19].mxu1 }
 0x125   : > { %v1222_v35 = vpop.f32.mrb[21].mxu0  ;;  %v1017_v36 = vadd.f32 %v1016_v34, %v1015_v23 }
 0x126   : > { %v1223_v37 = vadd.f32 %v1222_v35, %v1221_v31  ;;  %941 = vst.msk [vmem:[%s1789_s23 + $0x48] sm:$0xff] %vm931_vm1, %v898_v2  ;;  %v965_v38 = vsel %vm931_vm1, %v898_v2, 0.0  ;;  %v994_v39 = vmul.f32 %v898_v2, %v898_v2 }
 0x127   : > { %v966_v40 = vadd.f32 %v965_v38, %v964_v27  ;;  %v902_v41 = vpop.f32.mrb[20].mxu1 }
 0x128   : > { %v1224_v42 = vpop.f32.mrb[22].mxu0  ;;  %v1018_v43 = vsel %vm931_vm1, %v994_v39, 0.0  ;;  %v903_v44 = vadd.f32 %v1223_v37, %v902_v41  ;;  %v904_v4 = vpop.f32.mrb[21].mxu1 }
 0x129   : > { %v1225_v47 = vpop.f32.mrb[23].mxu0  ;;  %v1019_v62 = vadd.f32 %v1018_v43, %v1017_v36 }
 0x12a   : > { %v1226_v48 = vadd.f32 %v1225_v47, %v1224_v42  ;;  %942 = vst.msk [vmem:[%s1789_s23 + $0x50] sm:$0xff] %vm931_vm1, %v903_v44  ;;  %v967_v49 = vsel %vm931_vm1, %v903_v44, 0.0  ;;  %v995_v50 = vmul.f32 %v903_v44, %v903_v44 }
 0x12b   : > { %v968_v51 = vadd.f32 %v967_v49, %v966_v40  ;;  %v907_v52 = vpop.f32.mrb[22].mxu1 }
 0x12c   : > { %v1227_v6 = vpop.f32.mrb[24].mxu0  ;;  %v1020_v53 = vsel %vm931_vm1, %v995_v50, 0.0  ;;  %v908_v54 = vadd.f32 %v1226_v48, %v907_v52  ;;  %v909_v55 = vpop.f32.mrb[23].mxu1 }
 0x12d   : > { %v1228_v56 = vpop.f32.mrb[25].mxu0  ;;  %v1021_v28 = vadd.f32 %v1020_v53, %v1019_v62 }
 0x12e   : > { %v1229_v29 = vadd.f32 %v1228_v56, %v1227_v6  ;;  %943 = vst.msk [vmem:[%s1789_s23 + $0x58] sm:$0xff] %vm931_vm1, %v908_v54  ;;  %v969_v32 = vsel %vm931_vm1, %v908_v54, 0.0  ;;  %v996_v33 = vmul.f32 %v908_v54, %v908_v54 }
 0x12f   : > { %v970_v57 = vadd.f32 %v969_v32, %v968_v51  ;;  %v912_v45 = vpop.f32.mrb[24].mxu1 }
 0x130   : > { %v1230_v46 = vpop.f32.mrb[26].mxu0  ;;  %v1022_v58 = vsel %vm931_vm1, %v996_v33, 0.0  ;;  %v913_v59 = vadd.f32 %v1229_v29, %v912_v45  ;;  %v914_v60 = vpop.f32.mrb[25].mxu1 }
 0x131   : > { %v1231_v63 = vpop.f32.mrb[27].mxu0  ;;  %v1023_v0 = vadd.f32 %v1022_v58, %v1021_v28 }
 0x132   : > { %v1232_v1 = vadd.f32 %v1231_v63, %v1230_v46  ;;  %944 = vst.msk [vmem:[%s1789_s23 + $0x60] sm:$0xff] %vm931_vm1, %v913_v59  ;;  %v971_v5 = vsel %vm931_vm1, %v913_v59, 0.0  ;;  %v997_v7 = vmul.f32 %v913_v59, %v913_v59 }
 0x133   : > { %v972_v8 = vadd.f32 %v971_v5, %v970_v57  ;;  %v917_v9 = vpop.f32.mrb[26].mxu1 }
 0x134   : > { %v1233_v10 = vpop.f32.mrb[28].mxu0  ;;  %v1024_v11 = vsel %vm931_vm1, %v997_v7, 0.0  ;;  %v918_v12 = vadd.f32 %v1232_v1, %v917_v9  ;;  %v919_v13 = vpop.f32.mrb[27].mxu1 }
 0x135   : > { %v1234_v14 = vpop.f32.mrb[29].mxu0  ;;  %v1025_v15 = vadd.f32 %v1024_v11, %v1023_v0 }
 0x136   : > { %v1235_v16 = vadd.f32 %v1234_v14, %v1233_v10  ;;  %945 = vst.msk [vmem:[%s1789_s23 + $0x68] sm:$0xff] %vm931_vm1, %v918_v12  ;;  %v973_v17 = vsel %vm931_vm1, %v918_v12, 0.0  ;;  %v998_v3 = vmul.f32 %v918_v12, %v918_v12 }
 0x137   : > { %v974_v18 = vadd.f32 %v973_v17, %v972_v8  ;;  %v922_v19 = vpop.f32.mrb[28].mxu1 }
 0x138   : > { %v1236_v20 = vpop.f32.mrb[30].mxu0  ;;  %v1026_v21 = vsel %vm931_vm1, %v998_v3, 0.0  ;;  %v923_v22 = vadd.f32 %v1235_v16, %v922_v19  ;;  %v924_v23 = vpop.f32.mrb[29].mxu1 }
 0x139   : > { %v1237_v24 = vpop.f32.mrb[31].mxu0  ;;  %v1027_v25 = vadd.f32 %v1026_v21, %v1025_v15 }
 0x13a   : > { %v1238_v26 = vadd.f32 %v1237_v24, %v1236_v20  ;;  %946 = vst.msk [vmem:[%s1789_s23 + $0x70] sm:$0xff] %vm931_vm1, %v923_v22  ;;  %v975_v27 = vsel %vm931_vm1, %v923_v22, 0.0  ;;  %v999_v30 = vmul.f32 %v923_v22, %v923_v22 }
 0x13b   : > { %v976_v31 = vadd.f32 %v975_v27, %v974_v18  ;;  %v927_v34 = vpop.f32.mrb[30].mxu1 }
 0x13c   : > { %v1028_v2 = vsel %vm931_vm1, %v999_v30, 0.0  ;;  %v928_v61 = vadd.f32 %v1238_v26, %v927_v34  ;;  %v929_v35 = vpop.f32.mrb[31].mxu1 }
 0x13d   : > { %v1029_v36 = vadd.f32 %v1028_v2, %v1027_v25 }
 0x13e   : > { %947 = vst.msk [vmem:[%s1789_s23 + $0x78] sm:$0xff] %vm931_vm1, %v928_v61  ;;  %v977_v37 = vsel %vm931_vm1, %v928_v61, 0.0  ;;  %v1000_v38 = vmul.f32 %v928_v61, %v928_v61 }
 0x13f   : > { %v978_v39 = vadd.f32 %v977_v37, %v976_v31 }
 0x140   : > { %v1030_v40 = vsel %vm931_vm1, %v1000_v38, 0.0 }
 0x141   : > { %v979_v41 = vrot.slane %v978_v39, 4  ;;  %v1031_v42 = vadd.f32 %v1030_v40, %v1029_v36 }
 0x143   : > { %v980_v43 = vadd.f32 %v979_v41, %v978_v39  ;;  %v1032_v44 = vrot.slane %v1031_v42, 4 }
 0x145   : > { %v981_v4 = vrot.slane %v980_v43, 2  ;;  %v1033_v47 = vadd.f32 %v1032_v44, %v1031_v42 }
 0x147   : > { %v982_v62 = vadd.f32 %v981_v4, %v980_v43  ;;  %v1034_v48 = vrot.slane %v1033_v47, 2 }
 0x149   : > { %v983_v49 = vrot.slane %v982_v62, 1  ;;  %v1035_v50 = vadd.f32 %v1034_v48, %v1033_v47 }
 0x14b   : > { %v1036_v51 = vrot.slane %v1035_v50, 1  ;;  %v984_v52 = vadd.f32 %v983_v49, %v982_v62 }
 0x14d   : > { %v1037_v6 = vadd.f32 %v1036_v51, %v1035_v50 }
 0x14f   : > { %v1039_v53 = vsel %vm1038_vm2, %v984_v52, %v1037_v6 }
 0x150   : > { %1041 = vst.msk [vmem:[%s241_s27] sm:$0x3] %vm1040_vm3, %v1039_v53 }
 0x151 PF: > { %s16_s18 = sadd.s32 1, %s1313_s18  }
 0x152   : > { %p13_p5 = scmp.ge.s32.totalorder %s16_s18, 4  }
 0x154   :  { %15 = sbr.rel (!%p13_p5) target bundleno = 1 (0x1), region = 78 }

// kernel: pg_forward.5
= control target key start
LH: loop header
LB: loop body
LE: loop exit
PB: predicated region body
PF: predicated region fallthrough
CT: control target
= control target key end

     0   :  { %s662_s23 = smov 0   ;;  %s803_s0 = inlined_call_operand.vmem [shape: f32[256,32], index: 0, kind: input, shape index: {}]   ;;  %s804_s1 = inlined_call_operand.vmem [shape: f32[1,32], index: 1, kind: input, shape index: {}]   ;;  %s805_s2 = inlined_call_operand.vmem [shape: f32[1,32], index: 2, kind: input, shape index: {}]   ;;  %s806_s3 = inlined_call_operand.vmem [shape: f32[128,32], index: 3, kind: input, shape index: {}]   ;;  %s807_s4 = inlined_call_operand.vmem [shape: f32[8,128], index: 4, kind: input, shape index: {}]   ;;  %s808_s5 = inlined_call_operand.<no memory space> [shape: f32[1,1], index: 5, kind: input, shape index: {}]   ;;  %s809_s6 = inlined_call_operand.vmem [shape: f32[16,1], index: 6, kind: output, shape index: {}]  }
   0x1   :  { %v11_v0 = vstv %s808_s5 }
   0x2   :  { %12 = vst [vmem:[#allocation2] sm:$0x1] %v11_v0 }
   0x3 LB: > { %s668_s24 = sadd.s32 4294967295, %s619_s23   ;;  %p512_p0 = scmp.ge.s32.totalorder %s619_s23, 1  ;;  %s619_s23 = sphi %s662_s23, %s18_s23  }
   0x4   : > { %p215_p1 = scmp.lt.s32.totalorder %s619_s23, 3 }
   0x6   : > { %p216_p2 = pnand %p512_p0, %p215_p1 }
   0x7   : > { %s513_s25 = sshll.u32 (!%p216_p2), %s668_s24, 4  ;;  %v621_v1 = vmov (!%p216_p2), 0.0|0.0   ;;  %vm622_vm0 = vmmov (!%p216_p2), 0   ;;  %v623_v2 = vmov (!%p216_p2), 0.0   ;;  %v677_v3 = vld [vmem:[%s804_s1] ss:$0 sm:$0xff] (!%p216_p2) }
   0x8   : > { %219 = sbr.rel (%p216_p2) target bundleno = 444 (0x1bc), region = 44  ;;  %574 = vmatprep.subr.bf16.mxu0 (!%p216_p2), %v621_v1  ;;  %p245_p3 = scmp.lt.s32.totalorder (!%p216_p2), %s513_s25, 31  ;;  %571 = vmatprep.mubr.msk.f32.mxu0 (!%p216_p2), %vm622_vm0, %v623_v2  ;;  %v687_v4 = vld [vmem:[%s805_s2] ss:$0 sm:$0xff] (!%p216_p2)  ;;  %v333_v24 = vld [vmem:[%s806_s3 + $0x8] sm:$0xff] (!%p216_p2)  ;;  %v334_v26 = vld [vmem:[%s806_s3 + $0x10] sm:$0xff] (!%p216_p2) }
   0x9   : > { %v332_v23 = vld [vmem:[%s806_s3] sm:$0xff] (!%p216_p2)  ;;  %v335_v33 = vld [vmem:[%s806_s3 + $0x18] sm:$0xff] (!%p216_p2)  ;;  %v337_v45 = vld [vmem:[%s806_s3 + $0x28] sm:$0xff] (!%p216_p2)  ;;  %vm435_vm1 = vcmask (!%p216_p2), 261120   ;;  %p250_p4 = scmp.lt.s32.totalorder (!%p216_p2), %s668_s24, 1  ;;  %vm453_vm2 = vcmask (!%p216_p2), 7168  }
   0xa   : > { %v336_v44 = vld [vmem:[%s806_s3 + $0x20] sm:$0xff] (!%p216_p2)  ;;  %v338_v56 = vld [vmem:[%s806_s3 + $0x30] sm:$0xff] (!%p216_p2)  ;;  %v339_v57 = vld [vmem:[%s806_s3 + $0x38] sm:$0xff] (!%p216_p2) }
   0xf   : > { %s811_s25 = smov (!%p245_p3, %s513_s25), 31  ;;  %s813_s24 = smov (!%p250_p4, %s668_s24), 1 }
  0x10   : > { %s514_s5 = sshll.u32 %s811_s25, 3  ;;  %s515_s20 = sshll.u32 %s813_s24, 3 }
  0x11   : > { %s682_s30 = scalar_lea.vmem %s803_s0, %s514_s5  ;;  %s253_s25 = scalar_lea.vmem %s809_s6, %s515_s20 }
  0x12   : > { %v254_v5 = vld [vmem:[%s682_s30] sm:$0xff]  ;;  %v255_v6 = vld [vmem:[%s682_s30 + $0x8] sm:$0xff]  ;;  %v256_v7 = vld [vmem:[%s682_s30 + $0x10] sm:$0xff] }
  0x13   : > { %v277_v8 = vmul.f32 %v677_v3, %v254_v5  ;;  %v278_v9 = vmul.f32 %v677_v3, %v255_v6  ;;  %v257_v10 = vld [vmem:[%s682_s30 + $0x18] sm:$0xff]  ;;  %v279_v11 = vmul.f32 %v677_v3, %v256_v7  ;;  %v258_v12 = vld [vmem:[%s682_s30 + $0x20] sm:$0xff]  ;;  %v259_v13 = vld [vmem:[%s682_s30 + $0x28] sm:$0xff] }
  0x14   : > { %v280_v14 = vmul.f32 %v677_v3, %v257_v10  ;;  %v281_v15 = vmul.f32 %v677_v3, %v258_v12  ;;  %v282_v16 = vmul.f32 %v677_v3, %v259_v13  ;;  %v260_v17 = vld [vmem:[%s682_s30 + $0x30] sm:$0xff]  ;;  %v261_v18 = vld [vmem:[%s682_s30 + $0x38] sm:$0xff]  ;;  %v262_v39 = vld [vmem:[%s682_s30 + $0x40] sm:$0xff] }
  0x15   : > { %v300_v19 = vadd.f32 %v687_v4, %v277_v8  ;;  %v301_v20 = vadd.f32 %v687_v4, %v278_v9  ;;  %v302_v21 = vadd.f32 %v687_v4, %v279_v11  ;;  %v283_v22 = vmul.f32 %v677_v3, %v260_v17  ;;  %v263_v40 = vld [vmem:[%s682_s30 + $0x48] sm:$0xff]  ;;  %v264_v46 = vld [vmem:[%s682_s30 + $0x50] sm:$0xff]  ;;  %v265_v49 = vld [vmem:[%s682_s30 + $0x58] sm:$0xff] }
  0x16   : > { %v303_v25 = vadd.f32 %v687_v4, %v280_v14  ;;  %v304_v27 = vadd.f32 %v687_v4, %v281_v15  ;;  %v305_v28 = vadd.f32 %v687_v4, %v282_v16  ;;  %v284_v29 = vmul.f32 %v677_v3, %v261_v18  ;;  %v266_v63 = vld [vmem:[%s682_s30 + $0x60] sm:$0xff]  ;;  %v267_v0 = vld [vmem:[%s682_s30 + $0x68] sm:$0xff]  ;;  %v268_v13 = vld [vmem:[%s682_s30 + $0x70] sm:$0xff] }
  0x17   : > { %v316_v30 = vmax.f32 %v300_v19, 0.0  ;;  %v317_v31 = vmax.f32 %v301_v20, 0.0  ;;  %v318_v32 = vmax.f32 %v302_v21, 0.0  ;;  %v306_v34 = vadd.f32 %v687_v4, %v283_v22  ;;  %v340_v14 = vld [vmem:[%s806_s3 + $0x40] sm:$0xff]  ;;  %v341_v15 = vld [vmem:[%s806_s3 + $0x48] sm:$0xff]  ;;  %v269_v16 = vld [vmem:[%s682_s30 + $0x78] sm:$0xff] }
  0x18   : > { %v319_v35 = vmax.f32 %v303_v25, 0.0  ;;  %v320_v36 = vmax.f32 %v304_v27, 0.0  ;;  %v321_v37 = vmax.f32 %v305_v28, 0.0  ;;  %v307_v38 = vadd.f32 %v687_v4, %v284_v29  ;;  %v342_v25 = vld [vmem:[%s806_s3 + $0x50] sm:$0xff]  ;;  %v343_v27 = vld [vmem:[%s806_s3 + $0x58] sm:$0xff] }
  0x19   : > { %v348_v41 = vmul.f32 %v332_v23, %v316_v30  ;;  %v349_v42 = vmul.f32 %v333_v24, %v317_v31  ;;  %v350_v43 = vmul.f32 %v334_v26, %v318_v32  ;;  %v322_v48 = vmax.f32 %v306_v34, 0.0 }
  0x1a   : > { %v351_v47 = vmul.f32 %v335_v33, %v319_v35  ;;  %v323_v51 = vmax.f32 %v307_v38, 0.0  ;;  %v285_v52 = vmul.f32 %v677_v3, %v262_v39  ;;  %v286_v53 = vmul.f32 %v677_v3, %v263_v40  ;;  %v345_v35 = vld [vmem:[%s806_s3 + $0x68] sm:$0xff] }
  0x1b   : > { %v575_v50 = vpack.c.bf16 %v349_v42, %v348_v41  ;;  %v352_v54 = vmul.f32 %v336_v44, %v320_v36  ;;  %v353_v55 = vmul.f32 %v337_v45, %v321_v37  ;;  %v287_v58 = vmul.f32 %v677_v3, %v264_v46  ;;  %v347_v41 = vld [vmem:[%s806_s3 + $0x78] sm:$0xff]  ;;  %v364_v46 = vld [vmem:[%s807_s4] sm:$0xff] }
  0x1c   : > { %v578_v59 = vpack.c.bf16 %v351_v47, %v350_v43  ;;  %v308_v60 = vadd.f32 %v687_v4, %v285_v52  ;;  %v309_v61 = vadd.f32 %v687_v4, %v286_v53  ;;  %v288_v62 = vmul.f32 %v677_v3, %v265_v49 }
  0x1d   : > { %576 = vmatpush3.bf16.msra.mxu0 %v575_v50  ;;  %v354_v2 = vmul.f32 %v338_v56, %v322_v48  ;;  %v355_v5 = vmul.f32 %v339_v57, %v323_v51  ;;  %v310_v6 = vadd.f32 %v687_v4, %v287_v58  ;;  %v289_v7 = vmul.f32 %v677_v3, %v266_v63  ;;  %v518_v50 = vld [vmem:[#allocation2] ss:$0 sm:$0xff] }
  0x1e   : > { %577 = vmatprep.subr.bf16.mxu0 %v621_v1  ;;  %v290_v8 = vmul.f32 %v677_v3, %v267_v0  ;;  %v581_v9 = vpack.c.bf16 %v353_v55, %v352_v54  ;;  %v324_v10 = vmax.f32 %v308_v60, 0.0  ;;  %v325_v11 = vmax.f32 %v309_v61, 0.0 }
  0x1f   : > { %v311_v12 = vadd.f32 %v687_v4, %v288_v62  ;;  %v584_v17 = vpack.c.bf16 %v355_v5, %v354_v2  ;;  %v326_v18 = vmax.f32 %v310_v6, 0.0  ;;  %v312_v19 = vadd.f32 %v687_v4, %v289_v7 }
  0x20   : > { %v313_v20 = vadd.f32 %v687_v4, %v290_v8  ;;  %v291_v21 = vmul.f32 %v677_v3, %v268_v13  ;;  %v356_v22 = vmul.f32 %v340_v14, %v324_v10  ;;  %v357_v23 = vmul.f32 %v341_v15, %v325_v11 }
  0x21   : > { %579 = vmatpush3.bf16.msra.mxu0 %v578_v59  ;;  %v327_v24 = vmax.f32 %v311_v12, 0.0  ;;  %v292_v26 = vmul.f32 %v677_v3, %v269_v16  ;;  %v358_v28 = vmul.f32 %v342_v25, %v326_v18  ;;  %v328_v29 = vmax.f32 %v312_v19, 0.0  ;;  %v344_v3 = vld [vmem:[%s806_s3 + $0x60] sm:$0xff] }
  0x22   : > { %580 = vmatprep.subr.bf16.mxu0 %v621_v1  ;;  %v314_v30 = vadd.f32 %v687_v4, %v291_v21  ;;  %v587_v31 = vpack.c.bf16 %v357_v23, %v356_v22  ;;  %v329_v33 = vmax.f32 %v313_v20, 0.0 }
  0x23   : > { %v359_v32 = vmul.f32 %v343_v27, %v327_v24  ;;  %v315_v34 = vadd.f32 %v687_v4, %v292_v26  ;;  %v360_v38 = vmul.f32 %v344_v3, %v328_v29  ;;  %v346_v4 = vld [vmem:[%s806_s3 + $0x70] sm:$0xff] }
  0x24   : > { %v330_v36 = vmax.f32 %v314_v30, 0.0  ;;  %v361_v39 = vmul.f32 %v345_v35, %v329_v33 }
  0x25   : > { %582 = vmatpush3.bf16.msra.mxu0 %v581_v9  ;;  %v590_v37 = vpack.c.bf16 %v359_v32, %v358_v28  ;;  %v331_v40 = vmax.f32 %v315_v34, 0.0 }
  0x26   : > { %583 = vmatprep.subr.bf16.mxu0 %v621_v1  ;;  %v593_v42 = vpack.c.bf16 %v361_v39, %v360_v38  ;;  %v362_v43 = vmul.f32 %v346_v4, %v330_v36 }
  0x27   : > { %v363_v44 = vmul.f32 %v347_v41, %v331_v40 }
  0x29   : > { %585 = vmatpush3.bf16.msra.mxu0 %v584_v17  ;;  %v596_v45 = vpack.c.bf16 %v363_v44, %v362_v43 }
  0x2a   : > { %586 = vmatprep.subr.bf16.mxu0 %v621_v1 }
  0x2d   : > { %588 = vmatpush3.bf16.msra.mxu0 %v587_v31 }
  0x2e   : > { %589 = vmatprep.subr.bf16.mxu0 %v621_v1 }
  0x31   : > { %591 = vmatpush3.bf16.msra.mxu0 %v590_v37 }
  0x32   : > { %592 = vmatprep.subr.bf16.mxu0 %v621_v1 }
  0x35   : > { %594 = vmatpush3.bf16.msra.mxu0 %v593_v42 }
  0x36   : > { %595 = vmatprep.subr.bf16.mxu0 %v621_v1 }
  0x39   : > { %597 = vmatpush3.bf16.msra.mxu0 %v596_v45 }
  0x3c   : > { %572 = vmatmul.mubr.f32.vlgmr.msra.gmra.mrb[0].mxu0 %v364_v46 }
 0x10f   : > { %v431_v47 = vpop.f32.mrb[0].mxu0 }
 0x110   : > { %v573_v48 = vpop.f32.mrb[1].mxu0  ;;  %v436_v49 = vsel %vm435_vm1, %v431_v47, 0.0 }
 0x111   : > { %437 = vadd.xlane.f32.xlu0 %v436_v49 }
 0x19e   : > { %v438_v51 = vpop.xlane.xlu0 %437 }
 0x19f   : > { %v446_v52 = vadd.f32 %v518_v50, %v438_v51 }
 0x1a1   : > { %v519_v53 = vmul.f32 -1.442695, %v446_v52 }
 0x1a3   : > { %609 = vpow2.f32 %v519_v53 }
 0x1ad   : > { %v610_v54 = vpop.eup %609 }
 0x1ae   : > { %v450_v1 = vadd.f32 1.0, %v610_v54 }
 0x1b0   : > { %611 = vrcp.f32 %v450_v1 }
 0x1ba   : > { %v612_v55 = vpop.eup %611 }
 0x1bb   : > { %454 = vst.msk [vmem:[%s253_s25] sm:$0xff] %vm453_vm2, %v612_v55 }
 0x1bc PF: > { %s18_s23 = sadd.s32 1, %s619_s23  }
 0x1bd   : > { %p15_p5 = scmp.ge.s32.totalorder %s18_s23, 4  }
 0x1bf   :  { %17 = sbr.rel (!%p15_p5) target bundleno = 3 (0x3), region = 74 }

</bundles_post_ra>
